<compile_context>
chip_gen: v6e
topology: v6e:2x2x1
jax: 0.10.0
libtpu: 0.0.40
codegen_flags: <defaults>
</compile_context>

<pallas_src>
from collections import namedtuple
from functools import partial

import numpy as np
import jax
import jax.numpy as jnp
from jax.experimental import pallas as pl
from jax.experimental.pallas import tpu as pltpu

LANES = 128
BN_EPS = 1e-5

LayerCfg = namedtuple(
    "LayerCfg", "cin cout k stride padding h_in w_in h_out w_out is_last")


# ---------------------------------------------------------------------------
# Fused kernel: the whole generator, intermediates VMEM-resident.
# ---------------------------------------------------------------------------
def _make_generator_kernel(cfg):
    def kernel(*refs):
        # refs = x_ref, then per layer [G, M] (+ [A, gamma, beta] if BN), out_ref.
        out_ref = refs[-1]
        x = refs[0][...]                                    # (N*H0, 128) bf16
        i = 1
        for lc in cfg:
            g_ref, m_ref = refs[i], refs[i + 1]
            i += 2
            acc = None
            # kH matmul pairs: constant row-scatter (G) then the lane-packed
            # W-direction transposed conv (M); f32 accumulation of <=64x128.
            for t in range(lc.k):
                rows = jnp.dot(g_ref[t], x,
                               preferred_element_type=jnp.float32
                               ).astype(jnp.bfloat16)       # exact 0/1 select
                part = jnp.dot(rows, m_ref[t],
                               preferred_element_type=jnp.float32)
                acc = part if acc is None else acc + part    # (N*H_out, 128)
            if lc.is_last:
                out_ref[...] = jnp.tanh(acc)                 # f32 output block
            else:
                a_ref, ga_ref, be_ref = refs[i], refs[i + 1], refs[i + 2]
                i += 3
                a = a_ref[...]
                # One-pass per-channel batch stats: row mean == mean over (N,H);
                # the A matmul averages the W lane-groups per channel and
                # broadcasts the result back into the (w, c) lane layout.
                m1 = jnp.mean(jnp.dot(acc, a,
                                      preferred_element_type=jnp.float32),
                              axis=0, keepdims=True)         # E[x]   per chan
                m2 = jnp.mean(jnp.dot(acc * acc, a,
                                      preferred_element_type=jnp.float32),
                              axis=0, keepdims=True)         # E[x^2] per chan
                var = m2 - m1 * m1
                y = (acc - m1) * jax.lax.rsqrt(var + BN_EPS) * ga_ref[...] \
                    + be_ref[...]
                x = jnp.maximum(y, 0.0).astype(jnp.bfloat16)
    return kernel


def _full_spec(shape):
    # Whole-array block, no grid.
    return pl.BlockSpec(shape, lambda *_: (0,) * len(shape))


# ---------------------------------------------------------------------------
# Parameter / constant construction (matches init_weight():
#   ConvTranspose2d weight ~ N(0, 0.02); BatchNorm gamma ~ N(1, 0.02), beta=0;
#   ConvTranspose2d bias=False per the module spec).
# ---------------------------------------------------------------------------
def init_params(convs, key, n, h_in, w_in, in_channels=1):
    """Returns (cfg, kernel_params, ref_params).

    G matrices are batch-block-diagonal row scatters, so the kernel constants
    are built for a fixed batch size `n` (fine for this script).
    """
    cfg, kparams, rparams = [], [], []
    cin, hi, wi = in_channels, h_in, w_in
    for idx, (cout, k, s, p) in enumerate(convs):
        key, wk, gk = jax.random.split(key, 3)
        ho = (hi - 1) * s - 2 * p + k
        wo = (wi - 1) * s - 2 * p + k
        assert wi * cin <= LANES and wo * cout <= LANES, \
            "row-as-lanes layout needs W*C <= 128 per layer"
        is_last = idx == len(convs) - 1

        # PyTorch ConvTranspose2d weight layout: (Cin, Cout, kH, kW).
        w = 0.02 * jax.random.normal(wk, (cin, cout, k, k), jnp.float32)
        w_np = np.asarray(w.astype(jnp.bfloat16).astype(jnp.float32))

        # M_ky[ix*cin + ci, ox*cout + co] = w[ci, co, ky, kx], kx = ox + p - s*ix
        m = np.zeros((k, LANES, LANES), np.float32)
        for ky in range(k):
            for ix in range(wi):
                for ox in range(wo):
                    kx = ox + p - s * ix
                    if 0 <= kx < k:
                        m[ky, ix * cin:(ix + 1) * cin,
                          ox * cout:(ox + 1) * cout] = w_np[:, :, ky, kx]

        # G_ky[b*Hout + oy, b*Hin + iy] = 1  iff  oy = s*iy + ky - p  (in range)
        g = np.zeros((k, n * ho, n * hi), np.float32)
        for ky in range(k):
            for iy in range(hi):
                oy = s * iy + ky - p
                if 0 <= oy < ho:
                    for b in range(n):
                        g[ky, b * ho + oy, b * hi + iy] = 1.0

        lp = {"G": jnp.asarray(g, jnp.bfloat16), "M": jnp.asarray(m, jnp.bfloat16)}
        rp = {"w": jnp.asarray(w_np)}
        if not is_last:
            gamma = 1.0 + 0.02 * jax.random.normal(gk, (cout,), jnp.float32)
            beta = jnp.zeros((cout,), jnp.float32)
            # Lane-group averaging matrix (averages over w per channel and
            # broadcasts back into the (w, c) lane layout; zero on pad lanes).
            a = np.zeros((LANES, LANES), np.float32)
            for co in range(cout):
                for ox in range(wo):
                    for ox2 in range(wo):
                        a[ox * cout + co, ox2 * cout + co] = 1.0 / wo
            glane = np.zeros((1, LANES), np.float32)
            blane = np.zeros((1, LANES), np.float32)
            gnp = np.asarray(gamma)
            for ox in range(wo):
                glane[0, ox * cout:(ox + 1) * cout] = gnp
            lp.update({"A": jnp.asarray(a),
                       "gamma": jnp.asarray(glane),
                       "beta": jnp.asarray(blane)})
            rp.update({"gamma": gamma, "beta": beta})

        cfg.append(LayerCfg(cin, cout, k, s, p, hi, wi, ho, wo, is_last))
        kparams.append(lp)
        rparams.append(rp)
        cin, hi, wi = cout, ho, wo
    return tuple(cfg), kparams, rparams


# ---------------------------------------------------------------------------
# Forward pass (NCHW in, NCHW out) -- one pallas_call for the whole network.
# ---------------------------------------------------------------------------
@partial(jax.jit, static_argnums=0)
def generator_forward(cfg, params, x_nchw):
    n, c0, h0, w0 = x_nchw.shape
    assert (c0, h0, w0) == (cfg[0].cin, cfg[0].h_in, cfg[0].w_in)

    # NCHW -> row-as-lanes (N*H, W*C), zero-padded to 128 lanes, bf16.
    x = jnp.transpose(x_nchw, (0, 2, 3, 1)).astype(jnp.float32)
    x = x.reshape(n * h0, w0 * c0)
    x = jnp.pad(x, ((0, 0), (0, LANES - w0 * c0))).astype(jnp.bfloat16)

    args = [x]
    for lc, lp in zip(cfg, params):
        args += [lp["G"], lp["M"]]
        if not lc.is_last:
            args += [lp["A"], lp["gamma"], lp["beta"]]

    last = cfg[-1]
    out_rows = n * last.h_out

    # Cost estimate in terms of the REAL work (real channels, not padded).
    flops = sum(2 * n * lc.h_out * lc.w_out * lc.k * lc.k * lc.cin * lc.cout
                for lc in cfg)
    transcendentals = n * last.h_out * last.w_out * last.cout           # tanh
    transcendentals += sum(lc.cout for lc in cfg if not lc.is_last)     # rsqrt
    bytes_accessed = sum(int(a.size) * a.dtype.itemsize for a in args)
    bytes_accessed += out_rows * LANES * 4

    out2d = pl.pallas_call(
        _make_generator_kernel(cfg),
        out_shape=jax.ShapeDtypeStruct((out_rows, LANES), jnp.float32),
        in_specs=[_full_spec(a.shape) for a in args],
        out_specs=_full_spec((out_rows, LANES)),
        compiler_params=pltpu.CompilerParams(
            vmem_limit_bytes=16 * 1024 * 1024),
        cost_estimate=pl.CostEstimate(
            flops=int(flops),
            transcendentals=int(transcendentals),
            bytes_accessed=int(bytes_accessed)),
    )(*args)

    out = out2d.reshape(n, last.h_out, LANES)[:, :, : last.w_out * last.cout]
    out = out.reshape(n, last.h_out, last.w_out, last.cout)
    return jnp.transpose(out, (0, 3, 1, 2))                 # -> NCHW


# ---------------------------------------------------------------------------
# Pure-JAX reference (same bf16-rounded weights) for validation.
# ---------------------------------------------------------------------------
def reference_forward(cfg, ref_params, x_nchw):
    x = jnp.transpose(x_nchw, (0, 2, 3, 1))                 # NHWC, f32
    for lc, rp in zip(cfg, ref_params):
        w = rp["w"]                                          # (Cin, Cout, kH, kW)
        k, s, p = lc.k, lc.stride, lc.padding
        # ConvTranspose2d(x, W, s, p) == dilated conv with flipped/transposed W.
        w_hwio = jnp.transpose(w[:, :, ::-1, ::-1], (2, 3, 0, 1))
        x = jax.lax.conv_general_dilated(
            x, w_hwio, window_strides=(1, 1),
            padding=[(k - 1 - p, k - 1 - p)] * 2,
            lhs_dilation=(s, s),
            dimension_numbers=("NHWC", "HWIO", "NHWC"),
            precision=jax.lax.Precision.HIGHEST)
        if lc.is_last:
            x = jnp.tanh(x)
        else:
            mean = jnp.mean(x, axis=(0, 1, 2))
            var = jnp.mean(jnp.square(x - mean), axis=(0, 1, 2))
            x = (x - mean) * jax.lax.rsqrt(var + BN_EPS) * rp["gamma"] + rp["beta"]
            x = jnp.maximum(x, 0.0)
    return jnp.transpose(x, (0, 3, 1, 2))


if __name__ == "__main__":
    # DCGenerator(convs) with convs = [(out_c, k, stride, pad), ...], in_channels=1.
    # Spatial path 4x4 -> 8x8 -> 16x16 -> 32x32 ; channels 1 -> 16 -> 8 -> 3.
    convs = [(16, 4, 2, 1), (8, 4, 2, 1), (3, 4, 2, 1)]
    N, C0, H0, W0 = 2, 1, 4, 4

    key = jax.random.PRNGKey(0)
    pkey, xkey = jax.random.split(key)
    cfg, params, ref_params = init_params(convs, pkey, n=N, h_in=H0, w_in=W0,
                                          in_channels=C0)

    x = jax.random.normal(xkey, (N, C0, H0, W0), jnp.float32)   # NCHW latent
    out = generator_forward(cfg, params, x)
    jax.block_until_ready(out)

    assert out.shape == (N, 3, 32, 32), out.shape
    assert bool(jnp.all(jnp.isfinite(out)))
    assert bool(jnp.all(jnp.abs(out) <= 1.0 + 1e-3))            # Tanh range

    # Numerical check against the pure-JAX reference (same bf16-rounded inputs).
    x_bf = x.astype(jnp.bfloat16).astype(jnp.float32)
    ref = reference_forward(cfg, ref_params, x_bf)
    err = float(jnp.max(jnp.abs(out - ref)))
    assert err < 3e-2, f"max abs error vs reference: {err}"
    print("KERNEL_OK")
</pallas_src>

<mosaic_0001>
module attributes {stable_mosaic.version = 11 : i64} {
  func.func @kernel(%arg0: memref<8x128xbf16, #tpu.memory_space<vmem>>, %arg1: memref<4x16x8xbf16, #tpu.memory_space<vmem>>, %arg2: memref<4x128x128xbf16, #tpu.memory_space<vmem>>, %arg3: memref<128x128xf32, #tpu.memory_space<vmem>>, %arg4: memref<1x128xf32, #tpu.memory_space<vmem>>, %arg5: memref<1x128xf32, #tpu.memory_space<vmem>>, %arg6: memref<4x32x16xbf16, #tpu.memory_space<vmem>>, %arg7: memref<4x128x128xbf16, #tpu.memory_space<vmem>>, %arg8: memref<128x128xf32, #tpu.memory_space<vmem>>, %arg9: memref<1x128xf32, #tpu.memory_space<vmem>>, %arg10: memref<1x128xf32, #tpu.memory_space<vmem>>, %arg11: memref<4x64x32xbf16, #tpu.memory_space<vmem>>, %arg12: memref<4x128x128xbf16, #tpu.memory_space<vmem>>, %arg13: memref<64x128xf32, #tpu.memory_space<vmem>>) attributes {dimension_semantics = [], scalar_prefetch = 0 : i64, scratch_operands = 0 : i64, tpu.core_type = #tpu.core_type<tc>} {
    %c0 = arith.constant 0 : index
    %c0_0 = arith.constant 0 : index
    %0 = vector.load %arg0[%c0, %c0_0] : memref<8x128xbf16, #tpu.memory_space<vmem>>, vector<8x128xbf16>
    %c0_1 = arith.constant 0 : index
    %c0_2 = arith.constant 0 : index
    %c0_3 = arith.constant 0 : index
    %1 = vector.load %arg1[%c0_1, %c0_2, %c0_3] : memref<4x16x8xbf16, #tpu.memory_space<vmem>>, vector<1x16x8xbf16>
    %2 = vector.shape_cast %1 : vector<1x16x8xbf16> to vector<16x8xbf16>
    %cst = arith.constant dense<0.000000e+00> : vector<16x128xf32>
    %3 = tpu.matmul %2, %0, %cst {dimension_numbers = #tpu.dot_dimension_numbers<[1], [0], [0], [1], [0, 0, 1, 1], [], []>} : vector<16x8xbf16>, vector<8x128xbf16>, vector<16x128xf32> -> vector<16x128xf32>
    %4 = arith.truncf %3 : vector<16x128xf32> to vector<16x128xbf16>
    %c0_4 = arith.constant 0 : index
    %c0_5 = arith.constant 0 : index
    %c0_6 = arith.constant 0 : index
    %5 = vector.load %arg2[%c0_4, %c0_5, %c0_6] : memref<4x128x128xbf16, #tpu.memory_space<vmem>>, vector<1x128x128xbf16>
    %6 = vector.shape_cast %5 : vector<1x128x128xbf16> to vector<128x128xbf16>
    %cst_7 = arith.constant dense<0.000000e+00> : vector<16x128xf32>
    %7 = tpu.matmul %4, %6, %cst_7 {dimension_numbers = #tpu.dot_dimension_numbers<[1], [0], [0], [1], [0, 0, 1, 1], [], []>} : vector<16x128xbf16>, vector<128x128xbf16>, vector<16x128xf32> -> vector<16x128xf32>
    %c1 = arith.constant 1 : index
    %c0_8 = arith.constant 0 : index
    %c0_9 = arith.constant 0 : index
    %8 = vector.load %arg1[%c1, %c0_8, %c0_9] : memref<4x16x8xbf16, #tpu.memory_space<vmem>>, vector<1x16x8xbf16>
    %9 = vector.shape_cast %8 : vector<1x16x8xbf16> to vector<16x8xbf16>
    %cst_10 = arith.constant dense<0.000000e+00> : vector<16x128xf32>
    %10 = tpu.matmul %9, %0, %cst_10 {dimension_numbers = #tpu.dot_dimension_numbers<[1], [0], [0], [1], [0, 0, 1, 1], [], []>} : vector<16x8xbf16>, vector<8x128xbf16>, vector<16x128xf32> -> vector<16x128xf32>
    %11 = arith.truncf %10 : vector<16x128xf32> to vector<16x128xbf16>
    %c1_11 = arith.constant 1 : index
    %c0_12 = arith.constant 0 : index
    %c0_13 = arith.constant 0 : index
    %12 = vector.load %arg2[%c1_11, %c0_12, %c0_13] : memref<4x128x128xbf16, #tpu.memory_space<vmem>>, vector<1x128x128xbf16>
    %13 = vector.shape_cast %12 : vector<1x128x128xbf16> to vector<128x128xbf16>
    %cst_14 = arith.constant dense<0.000000e+00> : vector<16x128xf32>
    %14 = tpu.matmul %11, %13, %cst_14 {dimension_numbers = #tpu.dot_dimension_numbers<[1], [0], [0], [1], [0, 0, 1, 1], [], []>} : vector<16x128xbf16>, vector<128x128xbf16>, vector<16x128xf32> -> vector<16x128xf32>
    %15 = arith.addf %7, %14 : vector<16x128xf32>
    %c2 = arith.constant 2 : index
    %c0_15 = arith.constant 0 : index
    %c0_16 = arith.constant 0 : index
    %16 = vector.load %arg1[%c2, %c0_15, %c0_16] : memref<4x16x8xbf16, #tpu.memory_space<vmem>>, vector<1x16x8xbf16>
    %17 = vector.shape_cast %16 : vector<1x16x8xbf16> to vector<16x8xbf16>
    %cst_17 = arith.constant dense<0.000000e+00> : vector<16x128xf32>
    %18 = tpu.matmul %17, %0, %cst_17 {dimension_numbers = #tpu.dot_dimension_numbers<[1], [0], [0], [1], [0, 0, 1, 1], [], []>} : vector<16x8xbf16>, vector<8x128xbf16>, vector<16x128xf32> -> vector<16x128xf32>
    %19 = arith.truncf %18 : vector<16x128xf32> to vector<16x128xbf16>
    %c2_18 = arith.constant 2 : index
    %c0_19 = arith.constant 0 : index
    %c0_20 = arith.constant 0 : index
    %20 = vector.load %arg2[%c2_18, %c0_19, %c0_20] : memref<4x128x128xbf16, #tpu.memory_space<vmem>>, vector<1x128x128xbf16>
    %21 = vector.shape_cast %20 : vector<1x128x128xbf16> to vector<128x128xbf16>
    %cst_21 = arith.constant dense<0.000000e+00> : vector<16x128xf32>
    %22 = tpu.matmul %19, %21, %cst_21 {dimension_numbers = #tpu.dot_dimension_numbers<[1], [0], [0], [1], [0, 0, 1, 1], [], []>} : vector<16x128xbf16>, vector<128x128xbf16>, vector<16x128xf32> -> vector<16x128xf32>
    %23 = arith.addf %15, %22 : vector<16x128xf32>
    %c3 = arith.constant 3 : index
    %c0_22 = arith.constant 0 : index
    %c0_23 = arith.constant 0 : index
    %24 = vector.load %arg1[%c3, %c0_22, %c0_23] : memref<4x16x8xbf16, #tpu.memory_space<vmem>>, vector<1x16x8xbf16>
    %25 = vector.shape_cast %24 : vector<1x16x8xbf16> to vector<16x8xbf16>
    %cst_24 = arith.constant dense<0.000000e+00> : vector<16x128xf32>
    %26 = tpu.matmul %25, %0, %cst_24 {dimension_numbers = #tpu.dot_dimension_numbers<[1], [0], [0], [1], [0, 0, 1, 1], [], []>} : vector<16x8xbf16>, vector<8x128xbf16>, vector<16x128xf32> -> vector<16x128xf32>
    %27 = arith.truncf %26 : vector<16x128xf32> to vector<16x128xbf16>
    %c3_25 = arith.constant 3 : index
    %c0_26 = arith.constant 0 : index
    %c0_27 = arith.constant 0 : index
    %28 = vector.load %arg2[%c3_25, %c0_26, %c0_27] : memref<4x128x128xbf16, #tpu.memory_space<vmem>>, vector<1x128x128xbf16>
    %29 = vector.shape_cast %28 : vector<1x128x128xbf16> to vector<128x128xbf16>
    %cst_28 = arith.constant dense<0.000000e+00> : vector<16x128xf32>
    %30 = tpu.matmul %27, %29, %cst_28 {dimension_numbers = #tpu.dot_dimension_numbers<[1], [0], [0], [1], [0, 0, 1, 1], [], []>} : vector<16x128xbf16>, vector<128x128xbf16>, vector<16x128xf32> -> vector<16x128xf32>
    %31 = arith.addf %23, %30 : vector<16x128xf32>
    %c0_29 = arith.constant 0 : index
    %c0_30 = arith.constant 0 : index
    %32 = vector.load %arg3[%c0_29, %c0_30] : memref<128x128xf32, #tpu.memory_space<vmem>>, vector<128x128xf32>
    %cst_31 = arith.constant dense<0.000000e+00> : vector<16x128xf32>
    %33 = tpu.matmul %31, %32, %cst_31 {dimension_numbers = #tpu.dot_dimension_numbers<[1], [0], [0], [1], [0, 0, 1, 1], [], []>} : vector<16x128xf32>, vector<128x128xf32>, vector<16x128xf32> -> vector<16x128xf32>
    %cst_32 = arith.constant dense<0.000000e+00> : vector<128xf32>
    %34 = vector.multi_reduction <add>, %33, %cst_32 [0] : vector<16x128xf32> to vector<128xf32>
    %35 = vector.shape_cast %34 : vector<128xf32> to vector<1x128xf32>
    %cst_33 = arith.constant 1.600000e+01 : f32
    %36 = vector.broadcast %cst_33 : f32 to vector<1x128xf32>
    %37 = arith.divf %35, %36 : vector<1x128xf32>
    %38 = arith.mulf %31, %31 : vector<16x128xf32>
    %cst_34 = arith.constant dense<0.000000e+00> : vector<16x128xf32>
    %39 = tpu.matmul %38, %32, %cst_34 {dimension_numbers = #tpu.dot_dimension_numbers<[1], [0], [0], [1], [0, 0, 1, 1], [], []>} : vector<16x128xf32>, vector<128x128xf32>, vector<16x128xf32> -> vector<16x128xf32>
    %cst_35 = arith.constant dense<0.000000e+00> : vector<128xf32>
    %40 = vector.multi_reduction <add>, %39, %cst_35 [0] : vector<16x128xf32> to vector<128xf32>
    %41 = vector.shape_cast %40 : vector<128xf32> to vector<1x128xf32>
    %cst_36 = arith.constant 1.600000e+01 : f32
    %42 = vector.broadcast %cst_36 : f32 to vector<1x128xf32>
    %43 = arith.divf %41, %42 : vector<1x128xf32>
    %44 = arith.mulf %37, %37 : vector<1x128xf32>
    %45 = arith.subf %43, %44 : vector<1x128xf32>
    %46 = vector.broadcast %37 : vector<1x128xf32> to vector<16x128xf32>
    %47 = arith.subf %31, %46 : vector<16x128xf32>
    %cst_37 = arith.constant 9.99999974E-6 : f32
    %48 = vector.broadcast %cst_37 : f32 to vector<1x128xf32>
    %49 = arith.addf %45, %48 : vector<1x128xf32>
    %50 = math.rsqrt %49 : vector<1x128xf32>
    %51 = vector.broadcast %50 : vector<1x128xf32> to vector<16x128xf32>
    %52 = arith.mulf %47, %51 : vector<16x128xf32>
    %c0_38 = arith.constant 0 : index
    %c0_39 = arith.constant 0 : index
    %53 = vector.load %arg4[%c0_38, %c0_39] : memref<1x128xf32, #tpu.memory_space<vmem>>, vector<1x128xf32>
    %54 = vector.broadcast %53 : vector<1x128xf32> to vector<16x128xf32>
    %55 = arith.mulf %52, %54 : vector<16x128xf32>
    %c0_40 = arith.constant 0 : index
    %c0_41 = arith.constant 0 : index
    %56 = vector.load %arg5[%c0_40, %c0_41] : memref<1x128xf32, #tpu.memory_space<vmem>>, vector<1x128xf32>
    %57 = vector.broadcast %56 : vector<1x128xf32> to vector<16x128xf32>
    %58 = arith.addf %55, %57 : vector<16x128xf32>
    %cst_42 = arith.constant 0.000000e+00 : f32
    %59 = vector.broadcast %cst_42 : f32 to vector<16x128xf32>
    %60 = arith.maximumf %58, %59 : vector<16x128xf32>
    %61 = arith.truncf %60 : vector<16x128xf32> to vector<16x128xbf16>
    %c0_43 = arith.constant 0 : index
    %c0_44 = arith.constant 0 : index
    %c0_45 = arith.constant 0 : index
    %62 = vector.load %arg6[%c0_43, %c0_44, %c0_45] : memref<4x32x16xbf16, #tpu.memory_space<vmem>>, vector<1x32x16xbf16>
    %63 = vector.shape_cast %62 : vector<1x32x16xbf16> to vector<32x16xbf16>
    %cst_46 = arith.constant dense<0.000000e+00> : vector<32x128xf32>
    %64 = tpu.matmul %63, %61, %cst_46 {dimension_numbers = #tpu.dot_dimension_numbers<[1], [0], [0], [1], [0, 0, 1, 1], [], []>} : vector<32x16xbf16>, vector<16x128xbf16>, vector<32x128xf32> -> vector<32x128xf32>
    %65 = arith.truncf %64 : vector<32x128xf32> to vector<32x128xbf16>
    %c0_47 = arith.constant 0 : index
    %c0_48 = arith.constant 0 : index
    %c0_49 = arith.constant 0 : index
    %66 = vector.load %arg7[%c0_47, %c0_48, %c0_49] : memref<4x128x128xbf16, #tpu.memory_space<vmem>>, vector<1x128x128xbf16>
    %67 = vector.shape_cast %66 : vector<1x128x128xbf16> to vector<128x128xbf16>
    %cst_50 = arith.constant dense<0.000000e+00> : vector<32x128xf32>
    %68 = tpu.matmul %65, %67, %cst_50 {dimension_numbers = #tpu.dot_dimension_numbers<[1], [0], [0], [1], [0, 0, 1, 1], [], []>} : vector<32x128xbf16>, vector<128x128xbf16>, vector<32x128xf32> -> vector<32x128xf32>
    %c1_51 = arith.constant 1 : index
    %c0_52 = arith.constant 0 : index
    %c0_53 = arith.constant 0 : index
    %69 = vector.load %arg6[%c1_51, %c0_52, %c0_53] : memref<4x32x16xbf16, #tpu.memory_space<vmem>>, vector<1x32x16xbf16>
    %70 = vector.shape_cast %69 : vector<1x32x16xbf16> to vector<32x16xbf16>
    %cst_54 = arith.constant dense<0.000000e+00> : vector<32x128xf32>
    %71 = tpu.matmul %70, %61, %cst_54 {dimension_numbers = #tpu.dot_dimension_numbers<[1], [0], [0], [1], [0, 0, 1, 1], [], []>} : vector<32x16xbf16>, vector<16x128xbf16>, vector<32x128xf32> -> vector<32x128xf32>
    %72 = arith.truncf %71 : vector<32x128xf32> to vector<32x128xbf16>
    %c1_55 = arith.constant 1 : index
    %c0_56 = arith.constant 0 : index
    %c0_57 = arith.constant 0 : index
    %73 = vector.load %arg7[%c1_55, %c0_56, %c0_57] : memref<4x128x128xbf16, #tpu.memory_space<vmem>>, vector<1x128x128xbf16>
    %74 = vector.shape_cast %73 : vector<1x128x128xbf16> to vector<128x128xbf16>
    %cst_58 = arith.constant dense<0.000000e+00> : vector<32x128xf32>
    %75 = tpu.matmul %72, %74, %cst_58 {dimension_numbers = #tpu.dot_dimension_numbers<[1], [0], [0], [1], [0, 0, 1, 1], [], []>} : vector<32x128xbf16>, vector<128x128xbf16>, vector<32x128xf32> -> vector<32x128xf32>
    %76 = arith.addf %68, %75 : vector<32x128xf32>
    %c2_59 = arith.constant 2 : index
    %c0_60 = arith.constant 0 : index
    %c0_61 = arith.constant 0 : index
    %77 = vector.load %arg6[%c2_59, %c0_60, %c0_61] : memref<4x32x16xbf16, #tpu.memory_space<vmem>>, vector<1x32x16xbf16>
    %78 = vector.shape_cast %77 : vector<1x32x16xbf16> to vector<32x16xbf16>
    %cst_62 = arith.constant dense<0.000000e+00> : vector<32x128xf32>
    %79 = tpu.matmul %78, %61, %cst_62 {dimension_numbers = #tpu.dot_dimension_numbers<[1], [0], [0], [1], [0, 0, 1, 1], [], []>} : vector<32x16xbf16>, vector<16x128xbf16>, vector<32x128xf32> -> vector<32x128xf32>
    %80 = arith.truncf %79 : vector<32x128xf32> to vector<32x128xbf16>
    %c2_63 = arith.constant 2 : index
    %c0_64 = arith.constant 0 : index
    %c0_65 = arith.constant 0 : index
    %81 = vector.load %arg7[%c2_63, %c0_64, %c0_65] : memref<4x128x128xbf16, #tpu.memory_space<vmem>>, vector<1x128x128xbf16>
    %82 = vector.shape_cast %81 : vector<1x128x128xbf16> to vector<128x128xbf16>
    %cst_66 = arith.constant dense<0.000000e+00> : vector<32x128xf32>
    %83 = tpu.matmul %80, %82, %cst_66 {dimension_numbers = #tpu.dot_dimension_numbers<[1], [0], [0], [1], [0, 0, 1, 1], [], []>} : vector<32x128xbf16>, vector<128x128xbf16>, vector<32x128xf32> -> vector<32x128xf32>
    %84 = arith.addf %76, %83 : vector<32x128xf32>
    %c3_67 = arith.constant 3 : index
    %c0_68 = arith.constant 0 : index
    %c0_69 = arith.constant 0 : index
    %85 = vector.load %arg6[%c3_67, %c0_68, %c0_69] : memref<4x32x16xbf16, #tpu.memory_space<vmem>>, vector<1x32x16xbf16>
    %86 = vector.shape_cast %85 : vector<1x32x16xbf16> to vector<32x16xbf16>
    %cst_70 = arith.constant dense<0.000000e+00> : vector<32x128xf32>
    %87 = tpu.matmul %86, %61, %cst_70 {dimension_numbers = #tpu.dot_dimension_numbers<[1], [0], [0], [1], [0, 0, 1, 1], [], []>} : vector<32x16xbf16>, vector<16x128xbf16>, vector<32x128xf32> -> vector<32x128xf32>
    %88 = arith.truncf %87 : vector<32x128xf32> to vector<32x128xbf16>
    %c3_71 = arith.constant 3 : index
    %c0_72 = arith.constant 0 : index
    %c0_73 = arith.constant 0 : index
    %89 = vector.load %arg7[%c3_71, %c0_72, %c0_73] : memref<4x128x128xbf16, #tpu.memory_space<vmem>>, vector<1x128x128xbf16>
    %90 = vector.shape_cast %89 : vector<1x128x128xbf16> to vector<128x128xbf16>
    %cst_74 = arith.constant dense<0.000000e+00> : vector<32x128xf32>
    %91 = tpu.matmul %88, %90, %cst_74 {dimension_numbers = #tpu.dot_dimension_numbers<[1], [0], [0], [1], [0, 0, 1, 1], [], []>} : vector<32x128xbf16>, vector<128x128xbf16>, vector<32x128xf32> -> vector<32x128xf32>
    %92 = arith.addf %84, %91 : vector<32x128xf32>
    %c0_75 = arith.constant 0 : index
    %c0_76 = arith.constant 0 : index
    %93 = vector.load %arg8[%c0_75, %c0_76] : memref<128x128xf32, #tpu.memory_space<vmem>>, vector<128x128xf32>
    %cst_77 = arith.constant dense<0.000000e+00> : vector<32x128xf32>
    %94 = tpu.matmul %92, %93, %cst_77 {dimension_numbers = #tpu.dot_dimension_numbers<[1], [0], [0], [1], [0, 0, 1, 1], [], []>} : vector<32x128xf32>, vector<128x128xf32>, vector<32x128xf32> -> vector<32x128xf32>
    %cst_78 = arith.constant dense<0.000000e+00> : vector<128xf32>
    %95 = vector.multi_reduction <add>, %94, %cst_78 [0] : vector<32x128xf32> to vector<128xf32>
    %96 = vector.shape_cast %95 : vector<128xf32> to vector<1x128xf32>
    %cst_79 = arith.constant 3.200000e+01 : f32
    %97 = vector.broadcast %cst_79 : f32 to vector<1x128xf32>
    %98 = arith.divf %96, %97 : vector<1x128xf32>
    %99 = arith.mulf %92, %92 : vector<32x128xf32>
    %cst_80 = arith.constant dense<0.000000e+00> : vector<32x128xf32>
    %100 = tpu.matmul %99, %93, %cst_80 {dimension_numbers = #tpu.dot_dimension_numbers<[1], [0], [0], [1], [0, 0, 1, 1], [], []>} : vector<32x128xf32>, vector<128x128xf32>, vector<32x128xf32> -> vector<32x128xf32>
    %cst_81 = arith.constant dense<0.000000e+00> : vector<128xf32>
    %101 = vector.multi_reduction <add>, %100, %cst_81 [0] : vector<32x128xf32> to vector<128xf32>
    %102 = vector.shape_cast %101 : vector<128xf32> to vector<1x128xf32>
    %cst_82 = arith.constant 3.200000e+01 : f32
    %103 = vector.broadcast %cst_82 : f32 to vector<1x128xf32>
    %104 = arith.divf %102, %103 : vector<1x128xf32>
    %105 = arith.mulf %98, %98 : vector<1x128xf32>
    %106 = arith.subf %104, %105 : vector<1x128xf32>
    %107 = vector.broadcast %98 : vector<1x128xf32> to vector<32x128xf32>
    %108 = arith.subf %92, %107 : vector<32x128xf32>
    %cst_83 = arith.constant 9.99999974E-6 : f32
    %109 = vector.broadcast %cst_83 : f32 to vector<1x128xf32>
    %110 = arith.addf %106, %109 : vector<1x128xf32>
    %111 = math.rsqrt %110 : vector<1x128xf32>
    %112 = vector.broadcast %111 : vector<1x128xf32> to vector<32x128xf32>
    %113 = arith.mulf %108, %112 : vector<32x128xf32>
    %c0_84 = arith.constant 0 : index
    %c0_85 = arith.constant 0 : index
    %114 = vector.load %arg9[%c0_84, %c0_85] : memref<1x128xf32, #tpu.memory_space<vmem>>, vector<1x128xf32>
    %115 = vector.broadcast %114 : vector<1x128xf32> to vector<32x128xf32>
    %116 = arith.mulf %113, %115 : vector<32x128xf32>
    %c0_86 = arith.constant 0 : index
    %c0_87 = arith.constant 0 : index
    %117 = vector.load %arg10[%c0_86, %c0_87] : memref<1x128xf32, #tpu.memory_space<vmem>>, vector<1x128xf32>
    %118 = vector.broadcast %117 : vector<1x128xf32> to vector<32x128xf32>
    %119 = arith.addf %116, %118 : vector<32x128xf32>
    %cst_88 = arith.constant 0.000000e+00 : f32
    %120 = vector.broadcast %cst_88 : f32 to vector<32x128xf32>
    %121 = arith.maximumf %119, %120 : vector<32x128xf32>
    %122 = arith.truncf %121 : vector<32x128xf32> to vector<32x128xbf16>
    %c0_89 = arith.constant 0 : index
    %c0_90 = arith.constant 0 : index
    %c0_91 = arith.constant 0 : index
    %123 = vector.load %arg11[%c0_89, %c0_90, %c0_91] : memref<4x64x32xbf16, #tpu.memory_space<vmem>>, vector<1x64x32xbf16>
    %124 = vector.shape_cast %123 : vector<1x64x32xbf16> to vector<64x32xbf16>
    %cst_92 = arith.constant dense<0.000000e+00> : vector<64x128xf32>
    %125 = tpu.matmul %124, %122, %cst_92 {dimension_numbers = #tpu.dot_dimension_numbers<[1], [0], [0], [1], [0, 0, 1, 1], [], []>} : vector<64x32xbf16>, vector<32x128xbf16>, vector<64x128xf32> -> vector<64x128xf32>
    %126 = arith.truncf %125 : vector<64x128xf32> to vector<64x128xbf16>
    %c0_93 = arith.constant 0 : index
    %c0_94 = arith.constant 0 : index
    %c0_95 = arith.constant 0 : index
    %127 = vector.load %arg12[%c0_93, %c0_94, %c0_95] : memref<4x128x128xbf16, #tpu.memory_space<vmem>>, vector<1x128x128xbf16>
    %128 = vector.shape_cast %127 : vector<1x128x128xbf16> to vector<128x128xbf16>
    %cst_96 = arith.constant dense<0.000000e+00> : vector<64x128xf32>
    %129 = tpu.matmul %126, %128, %cst_96 {dimension_numbers = #tpu.dot_dimension_numbers<[1], [0], [0], [1], [0, 0, 1, 1], [], []>} : vector<64x128xbf16>, vector<128x128xbf16>, vector<64x128xf32> -> vector<64x128xf32>
    %c1_97 = arith.constant 1 : index
    %c0_98 = arith.constant 0 : index
    %c0_99 = arith.constant 0 : index
    %130 = vector.load %arg11[%c1_97, %c0_98, %c0_99] : memref<4x64x32xbf16, #tpu.memory_space<vmem>>, vector<1x64x32xbf16>
    %131 = vector.shape_cast %130 : vector<1x64x32xbf16> to vector<64x32xbf16>
    %cst_100 = arith.constant dense<0.000000e+00> : vector<64x128xf32>
    %132 = tpu.matmul %131, %122, %cst_100 {dimension_numbers = #tpu.dot_dimension_numbers<[1], [0], [0], [1], [0, 0, 1, 1], [], []>} : vector<64x32xbf16>, vector<32x128xbf16>, vector<64x128xf32> -> vector<64x128xf32>
    %133 = arith.truncf %132 : vector<64x128xf32> to vector<64x128xbf16>
    %c1_101 = arith.constant 1 : index
    %c0_102 = arith.constant 0 : index
    %c0_103 = arith.constant 0 : index
    %134 = vector.load %arg12[%c1_101, %c0_102, %c0_103] : memref<4x128x128xbf16, #tpu.memory_space<vmem>>, vector<1x128x128xbf16>
    %135 = vector.shape_cast %134 : vector<1x128x128xbf16> to vector<128x128xbf16>
    %cst_104 = arith.constant dense<0.000000e+00> : vector<64x128xf32>
    %136 = tpu.matmul %133, %135, %cst_104 {dimension_numbers = #tpu.dot_dimension_numbers<[1], [0], [0], [1], [0, 0, 1, 1], [], []>} : vector<64x128xbf16>, vector<128x128xbf16>, vector<64x128xf32> -> vector<64x128xf32>
    %137 = arith.addf %129, %136 : vector<64x128xf32>
    %c2_105 = arith.constant 2 : index
    %c0_106 = arith.constant 0 : index
    %c0_107 = arith.constant 0 : index
    %138 = vector.load %arg11[%c2_105, %c0_106, %c0_107] : memref<4x64x32xbf16, #tpu.memory_space<vmem>>, vector<1x64x32xbf16>
    %139 = vector.shape_cast %138 : vector<1x64x32xbf16> to vector<64x32xbf16>
    %cst_108 = arith.constant dense<0.000000e+00> : vector<64x128xf32>
    %140 = tpu.matmul %139, %122, %cst_108 {dimension_numbers = #tpu.dot_dimension_numbers<[1], [0], [0], [1], [0, 0, 1, 1], [], []>} : vector<64x32xbf16>, vector<32x128xbf16>, vector<64x128xf32> -> vector<64x128xf32>
    %141 = arith.truncf %140 : vector<64x128xf32> to vector<64x128xbf16>
    %c2_109 = arith.constant 2 : index
    %c0_110 = arith.constant 0 : index
    %c0_111 = arith.constant 0 : index
    %142 = vector.load %arg12[%c2_109, %c0_110, %c0_111] : memref<4x128x128xbf16, #tpu.memory_space<vmem>>, vector<1x128x128xbf16>
    %143 = vector.shape_cast %142 : vector<1x128x128xbf16> to vector<128x128xbf16>
    %cst_112 = arith.constant dense<0.000000e+00> : vector<64x128xf32>
    %144 = tpu.matmul %141, %143, %cst_112 {dimension_numbers = #tpu.dot_dimension_numbers<[1], [0], [0], [1], [0, 0, 1, 1], [], []>} : vector<64x128xbf16>, vector<128x128xbf16>, vector<64x128xf32> -> vector<64x128xf32>
    %145 = arith.addf %137, %144 : vector<64x128xf32>
    %c3_113 = arith.constant 3 : index
    %c0_114 = arith.constant 0 : index
    %c0_115 = arith.constant 0 : index
    %146 = vector.load %arg11[%c3_113, %c0_114, %c0_115] : memref<4x64x32xbf16, #tpu.memory_space<vmem>>, vector<1x64x32xbf16>
    %147 = vector.shape_cast %146 : vector<1x64x32xbf16> to vector<64x32xbf16>
    %cst_116 = arith.constant dense<0.000000e+00> : vector<64x128xf32>
    %148 = tpu.matmul %147, %122, %cst_116 {dimension_numbers = #tpu.dot_dimension_numbers<[1], [0], [0], [1], [0, 0, 1, 1], [], []>} : vector<64x32xbf16>, vector<32x128xbf16>, vector<64x128xf32> -> vector<64x128xf32>
    %149 = arith.truncf %148 : vector<64x128xf32> to vector<64x128xbf16>
    %c3_117 = arith.constant 3 : index
    %c0_118 = arith.constant 0 : index
    %c0_119 = arith.constant 0 : index
    %150 = vector.load %arg12[%c3_117, %c0_118, %c0_119] : memref<4x128x128xbf16, #tpu.memory_space<vmem>>, vector<1x128x128xbf16>
    %151 = vector.shape_cast %150 : vector<1x128x128xbf16> to vector<128x128xbf16>
    %cst_120 = arith.constant dense<0.000000e+00> : vector<64x128xf32>
    %152 = tpu.matmul %149, %151, %cst_120 {dimension_numbers = #tpu.dot_dimension_numbers<[1], [0], [0], [1], [0, 0, 1, 1], [], []>} : vector<64x128xbf16>, vector<128x128xbf16>, vector<64x128xf32> -> vector<64x128xf32>
    %153 = arith.addf %145, %152 : vector<64x128xf32>
    %154 = math.tanh %153 : vector<64x128xf32>
    %c0_121 = arith.constant 0 : index
    %c0_122 = arith.constant 0 : index
    %155 = vector.load %arg13[%c0_121, %c0_122] : memref<64x128xf32, #tpu.memory_space<vmem>>, vector<64x128xf32>
    tpu.vector_store %arg13[%c0_121, %c0_122], %154 {strides = array<i32>} : memref<64x128xf32, #tpu.memory_space<vmem>>, vector<64x128xf32>,
    return
  }
}

</mosaic_0001>

<bundles_post_ra>
// kernel: generator_forward.1
= control target key start
LH: loop header
LB: loop body
LE: loop exit
PB: predicated region body
PF: predicated region fallthrough
CT: control target
= control target key end

     0   :  { %18 = vsyncpa [#allocation3], 0  ;;  %s4661_s0 = inlined_call_operand.vmem [shape: bf16[8,128], index: 0, kind: input, shape index: {}]   ;;  %s4662_s1 = inlined_call_operand.vmem [shape: bf16[4,16,8], index: 1, kind: input, shape index: {}]   ;;  %s4663_s2 = inlined_call_operand.vmem [shape: bf16[4,128,128], index: 2, kind: input, shape index: {}]   ;;  %s4664_s3 = inlined_call_operand.hbm [shape: f32[128,128], index: 3, kind: input, shape index: {}]   ;;  %s4665_s4 = inlined_call_operand.vmem [shape: f32[1,128], index: 4, kind: input, shape index: {}]   ;;  %s4666_s5 = inlined_call_operand.vmem [shape: f32[1,128], index: 5, kind: input, shape index: {}]   ;;  %s4667_s6 = inlined_call_operand.vmem [shape: bf16[4,32,16], index: 6, kind: input, shape index: {}]   ;;  %s4668_s7 = inlined_call_operand.hbm [shape: bf16[4,128,128], index: 7, kind: input, shape index: {}]   ;;  %s4669_s8 = inlined_call_operand.hbm [shape: f32[128,128], index: 8, kind: input, shape index: {}]   ;;  %s4670_s9 = inlined_call_operand.vmem [shape: f32[1,128], index: 9, kind: input, shape index: {}]   ;;  %s4671_s10 = inlined_call_operand.vmem [shape: f32[1,128], index: 10, kind: input, shape index: {}]   ;;  %s4672_s11 = inlined_call_operand.vmem [shape: bf16[4,64,32], index: 11, kind: input, shape index: {}]   ;;  %s4673_s12 = inlined_call_operand.hbm [shape: bf16[4,128,128], index: 12, kind: input, shape index: {}]   ;;  %s4674_s13 = inlined_call_operand.vmem [shape: f32[64,128], index: 13, kind: output, shape index: {}]  }
   0x1   :  { %19 = vsyncpa [#allocation5], 0 }
   0x2   :  { %20 = vsyncpa [#allocation8], 0  ;;  %s4186_s25 = smov [#allocation4]  }
   0x3   :  { %s50_s26 = sshll.u32 %s4186_s25, 4  ;;  %s51_s26 = int_to_ptr.vmem [resolvable:$true] %s50_s26 }
   0x4   :  { %s4108_s27 = scalar_lea.vmem %s51_s26, 4096  ;;  %p4113_p1 = scmp.lt.s32.totalorder %s51_s26, %s51_s26 }
   0x5   :  { %p4109_p0 = scmp.ne.s32.totalorder %s51_s26, %s4108_s27  ;;  %p4114_p2 = scmp.lt.s32.totalorder %s4108_s27, %s4108_s27 }
   0x7   :  { %p4115_p3 = por %p4114_p2, %p4113_p1 }
   0x9   :  { %p4116_p4 = pnand %p4115_p3, %p4109_p0 }
   0xb   :  { %4119 = shalt.err (!%p4116_p4)
}
   0xc   :  { %s4187_s28 = smov 64   ;;  %s4188_s29 = smov 4  }
   0xd   :  { %56 = dma.hbm_to_vmem [thread:$0]  %s4668_s7, 4096, %s51_s26, [#allocation5], %s4187_s28, %s4187_s28, %s4188_s29  }
   0xe   :  { %s4189_s15 = smov [#allocation2]  }
   0xf   :  { %s32_s16 = sshll.u32 %s4189_s15, 4  ;;  %s33_s16 = int_to_ptr.vmem [resolvable:$true] %s32_s16 }
  0x10   :  { %s4128_s17 = scalar_lea.vmem %s33_s16, 2048  ;;  %p4133_p6 = scmp.lt.s32.totalorder %s33_s16, %s33_s16 }
  0x11   :  { %p4129_p5 = scmp.ne.s32.totalorder %s33_s16, %s4128_s17  ;;  %p4134_p7 = scmp.lt.s32.totalorder %s4128_s17, %s4128_s17 }
  0x13   :  { %p4135_p8 = por %p4134_p7, %p4133_p6 }
  0x15   :  { %p4136_p9 = pnand %p4135_p8, %p4129_p5 }
  0x17   :  { %4139 = shalt.err (!%p4136_p9)
}
  0x18   :  { %s4190_s18 = smov 128   ;;  %s4191_s19 = smov 8  }
  0x19   :  { %38 = dma.hbm_to_vmem [thread:$0]  %s4664_s3, 2048, %s33_s16, [#allocation3], %s4190_s18, %s4190_s18, %s4191_s19  }
  0x1a   :  { %s4192_s22 = smov [#allocation6]   ;;  %s4193_s24 = smov [#allocation7]  }
  0x1b   :  { %s62_s23 = sshll.u32 %s4192_s22, 4  ;;  %s80_s7 = sshll.u32 %s4193_s24, 4  ;;  %s63_s23 = int_to_ptr.vmem [resolvable:$true] %s62_s23  ;;  %s81_s7 = int_to_ptr.vmem [resolvable:$true] %s80_s7 }
  0x1c   :  { %s4148_s25 = scalar_lea.vmem %s63_s23, 2048  ;;  %p4153_p11 = scmp.lt.s32.totalorder %s63_s23, %s63_s23 }
  0x1d   :  { %p4149_p10 = scmp.ne.s32.totalorder %s63_s23, %s4148_s25  ;;  %p4154_p12 = scmp.lt.s32.totalorder %s4148_s25, %s4148_s25 }
  0x1f   :  { %p4155_p13 = por %p4154_p12, %p4153_p11 }
  0x21   :  { %p4156_p0 = pnand %p4155_p13, %p4149_p10 }
  0x23   :  { %4159 = shalt.err (!%p4156_p0)
}
  0x24   :  { %68 = dma.hbm_to_vmem [thread:$0]  %s4669_s8, 2048, %s63_s23, [#allocation5], %s4190_s18, %s4190_s18, %s4191_s19  }
  0x25   :  { %s4168_s30 = scalar_lea.vmem %s81_s7, 4096  ;;  %p4173_p2 = scmp.lt.s32.totalorder %s81_s7, %s81_s7 }
  0x26   :  { %p4169_p1 = scmp.ne.s32.totalorder %s81_s7, %s4168_s30  ;;  %p4174_p3 = scmp.lt.s32.totalorder %s4168_s30, %s4168_s30 }
  0x28   :  { %p4175_p4 = por %p4174_p3, %p4173_p2 }
  0x2a   :  { %p4176_p5 = pnand %p4175_p4, %p4169_p1 }
  0x2c   :  { %4179 = shalt.err (!%p4176_p5)
}
  0x2d   :  { %86 = dma.hbm_to_vmem [thread:$0]  %s4673_s12, 4096, %s81_s7, [#allocation8], %s4187_s28, %s4187_s28, %s4188_s29  }
  0x2e   :  { %4180 = dma.done.wait [#allocation3], 2048  }
  0x2f   :  { %4181 = vsyncadd [#allocation3], 4294965248 }
  0x30   :  { %4182 = dma.done.wait [#allocation5], 6144  }
  0x31   :  { %4183 = vsyncadd [#allocation5], 4294961152 }
  0x32   :  { %4184 = dma.done.wait [#allocation8], 4096  }
  0x33   :  { %4185 = vsyncadd [#allocation8], 4294963200  ;;  %v4194_v0 = vmov 0.0   ;;  %vm4195_vm0 = vmmov 0   ;;  %vm112_vm1 = vcmask 1043456   ;;  %v3956_v3 = vld [vmem:[%s4662_s1] sm:$0xff]  }
  0x34   :  { %3448 = vmatprep.subr.bf16.mxu0 %v4194_v0  ;;  %3454 = vmatprep.subr.bf16.mxu1 %v4194_v0  ;;  %v100_v1 = vld [vmem:[%s4661_s0] sm:$0xf]  ;;  %vm108_vm2 = vcmask 64512   ;;  %v3957_v4 = vld [vmem:[%s4662_s1 + $0x8] sm:$0xff]   ;;  %v3958_v5 = vld [vmem:[%s4663_s2 + $0x78] sm:$0xff]   ;;  %vm972_vm3 = vcmask 130048  }
  0x35   :  { %3450 = vmatprep.mubr.msk.bf16.mxu0 %vm4195_vm0, %v4194_v0  ;;  %3456 = vmatprep.mubr.msk.bf16.mxu1 %vm4195_vm0, %v4194_v0  ;;  %v4293_v2 = vsel %vm112_vm1, %v100_v1, 0  ;;  %v3959_v6 = vld [vmem:[%s4663_s2 + $0x38] sm:$0xff]   ;;  %v3960_v7 = vld [vmem:[%s4663_s2 + $0x70] sm:$0xff]   ;;  %v3962_v9 = vld [vmem:[%s4663_s2 + $0x68] sm:$0xff]   ;;  %vm1988_vm4 = vcmask 261120  }
  0x36   :  { %3449 = vmatpush3.bf16.msra.mxu0 %v4293_v2  ;;  %3455 = vmatpush3.bf16.msra.mxu1 %v4293_v2  ;;  %v3961_v8 = vld [vmem:[%s4663_s2 + $0x30] sm:$0xff]   ;;  %v3963_v10 = vld [vmem:[%s4663_s2 + $0x28] sm:$0xff]   ;;  %v3964_v11 = vld [vmem:[%s4663_s2 + $0x60] sm:$0xff]  }
  0x37   :  { %3460 = vmatprep.subr.bf16.mxu0 %v4194_v0  ;;  %3480 = vmatprep.subr.bf16.mxu1 %v4194_v0  ;;  %v3965_v12 = vld [vmem:[%s4663_s2 + $0x20] sm:$0xff]   ;;  %v3966_v13 = vld [vmem:[%s4663_s2 + $0x58] sm:$0xff]   ;;  %v3968_v15 = vld [vmem:[%s4663_s2 + $0x50] sm:$0xff]  }
  0x38   :  { %v3967_v14 = vld [vmem:[%s4663_s2 + $0x18] sm:$0xff]   ;;  %v3969_v16 = vld [vmem:[%s4663_s2 + $0x10] sm:$0xff]   ;;  %v3970_v17 = vld [vmem:[%s4663_s2 + $0x48] sm:$0xff]  }
  0x39   :  { %3451 = vmatmul.mubr.msk.bf16.vlgmr.msra.gmra.mxu0 %vm108_vm2, %v3956_v3  ;;  %3457 = vmatmul.mubr.msk.bf16.vlgmr.msra.gmra.mxu1 %vm108_vm2, %v3957_v4  ;;  %v3971_v18 = vld [vmem:[%s4663_s2 + $0x8] sm:$0xff]   ;;  %v3972_v19 = vld [vmem:[%s4663_s2 + $0x40] sm:$0xff]   ;;  %v3974_v31 = vld [vmem:[%s4662_s1 + $0x10] sm:$0xff]  }
  0x3a   :  { %3461 = vmatpush3.bf16.msra.mxu0 %v3958_v5  ;;  %3481 = vmatpush3.bf16.msra.mxu1 %v3959_v6  ;;  %v3973_v20 = vld [vmem:[%s4663_s2] sm:$0xff]   ;;  %v3975_v32 = vld [vmem:[%s4662_s1 + $0x18] sm:$0xff]   ;;  %v3978_v35 = vld [vmem:[%s4663_s2 + $0xb0] sm:$0xff]  }
  0x3b   :  { %3462 = vmatprep.subr.bf16.mxu0 %v4194_v0  ;;  %3482 = vmatprep.subr.bf16.mxu1 %v4194_v0  ;;  %v3976_v33 = vld [vmem:[%s4663_s2 + $0xb8] sm:$0xff]   ;;  %v3979_v36 = vld [vmem:[%s4663_s2 + $0xf0] sm:$0xff]   ;;  %v3980_v37 = vld [vmem:[%s4663_s2 + $0xa8] sm:$0xff]  }
  0x3c   :  { %3476 = vmatprep.mubr.msk.bf16.mxu0 %vm4195_vm0, %v4194_v0  ;;  %3496 = vmatprep.mubr.msk.bf16.mxu1 %vm4195_vm0, %v4194_v0  ;;  %v3977_v34 = vld [vmem:[%s4663_s2 + $0xf8] sm:$0xff]   ;;  %v3981_v38 = vld [vmem:[%s4663_s2 + $0xe8] sm:$0xff]   ;;  %v3982_v39 = vld [vmem:[%s4663_s2 + $0xa0] sm:$0xff]  }
  0x3d   :  { %v3983_v40 = vld [vmem:[%s4663_s2 + $0xe0] sm:$0xff]   ;;  %v3984_v41 = vld [vmem:[%s4663_s2 + $0x98] sm:$0xff]   ;;  %v3986_v43 = vld [vmem:[%s4663_s2 + $0x90] sm:$0xff]  }
  0x3e   :  { %3463 = vmatpush3.bf16.msra.mxu0 %v3960_v7  ;;  %3483 = vmatpush3.bf16.msra.mxu1 %v3961_v8  ;;  %v3985_v42 = vld [vmem:[%s4663_s2 + $0xd8] sm:$0xff]   ;;  %v3987_v44 = vld [vmem:[%s4663_s2 + $0xd0] sm:$0xff]   ;;  %v3988_v45 = vld [vmem:[%s4663_s2 + $0x88] sm:$0xff]  }
  0x3f   :  { %3464 = vmatprep.subr.bf16.mxu0 %v4194_v0  ;;  %3484 = vmatprep.subr.bf16.mxu1 %v4194_v0  ;;  %v3989_v46 = vld [vmem:[%s4663_s2 + $0xc8] sm:$0xff]   ;;  %v3990_v47 = vld [vmem:[%s4663_s2 + $0x80] sm:$0xff]   ;;  %v759_v49 = vld [vmem:[#allocation2 + $0x78] sm:$0xff] }
  0x40   :  { %v3991_v48 = vld [vmem:[%s4663_s2 + $0xc0] sm:$0xff]   ;;  %v758_v6 = vld [vmem:[#allocation2 + $0x70] sm:$0xff]  ;;  %v757_v7 = vld [vmem:[#allocation2 + $0x68] sm:$0xff] }
  0x41   :  { %v756_v8 = vld [vmem:[#allocation2 + $0x60] sm:$0xff] }
  0x42   :  { %3465 = vmatpush3.bf16.msra.mxu0 %v3962_v9  ;;  %3485 = vmatpush3.bf16.msra.mxu1 %v3963_v10  ;;  %v755_v9 = vld [vmem:[#allocation2 + $0x58] sm:$0xff]  ;;  %v754_v10 = vld [vmem:[#allocation2 + $0x50] sm:$0xff] }
  0x43   :  { %3466 = vmatprep.subr.bf16.mxu0 %v4194_v0  ;;  %3486 = vmatprep.subr.bf16.mxu1 %v4194_v0 }
  0x46   :  { %3467 = vmatpush3.bf16.msra.mxu0 %v3964_v11  ;;  %3487 = vmatpush3.bf16.msra.mxu1 %v3965_v12  ;;  %v753_v11 = vld [vmem:[#allocation2 + $0x48] sm:$0xff]  ;;  %v752_v12 = vld [vmem:[#allocation2 + $0x40] sm:$0xff] }
  0x47   :  { %3468 = vmatprep.subr.bf16.mxu0 %v4194_v0  ;;  %3488 = vmatprep.subr.bf16.mxu1 %v4194_v0 }
  0x4a   :  { %3469 = vmatpush3.bf16.msra.mxu0 %v3966_v13  ;;  %3489 = vmatpush3.bf16.msra.mxu1 %v3967_v14  ;;  %v751_v13 = vld [vmem:[#allocation2 + $0x38] sm:$0xff]  ;;  %v750_v14 = vld [vmem:[#allocation2 + $0x30] sm:$0xff] }
  0x4b   :  { %3470 = vmatprep.subr.bf16.mxu0 %v4194_v0  ;;  %3490 = vmatprep.subr.bf16.mxu1 %v4194_v0 }
  0x4e   :  { %3471 = vmatpush3.bf16.msra.mxu0 %v3968_v15  ;;  %3491 = vmatpush3.bf16.msra.mxu1 %v3969_v16  ;;  %v749_v15 = vld [vmem:[#allocation2 + $0x28] sm:$0xff]  ;;  %v748_v16 = vld [vmem:[#allocation2 + $0x20] sm:$0xff] }
  0x4f   :  { %3472 = vmatprep.subr.bf16.mxu0 %v4194_v0  ;;  %3492 = vmatprep.subr.bf16.mxu1 %v4194_v0 }
  0x52   :  { %3473 = vmatpush3.bf16.msra.mxu0 %v3970_v17  ;;  %3493 = vmatpush3.bf16.msra.mxu1 %v3971_v18  ;;  %v747_v17 = vld [vmem:[#allocation2 + $0x18] sm:$0xff]  ;;  %v746_v18 = vld [vmem:[#allocation2 + $0x10] sm:$0xff] }
  0x53   :  { %3474 = vmatprep.subr.bf16.mxu0 %v4194_v0  ;;  %3494 = vmatprep.subr.bf16.mxu1 %v4194_v0 }
  0x56   :  { %3475 = vmatpush3.bf16.msra.mxu0 %v3972_v19  ;;  %3495 = vmatpush3.bf16.msra.mxu1 %v3973_v20  ;;  %v745_v19 = vld [vmem:[#allocation2 + $0x8] sm:$0xff]  ;;  %v744_v20 = vld [vmem:[#allocation2] sm:$0xff] }
  0x57   :  { %3500 = vmatprep.subr.bf16.mxu1 %v4194_v0  ;;  %3526 = vmatprep.subr.bf16.mxu0 %v4194_v0 }
  0xf9   :  { %v150_v21 = vpop.f32.mrf.mxu0  ;;  %v219_v22 = vpop.f32.mrf.mxu1 }
  0xfb   :  { %v3452_v23 = vpop.f32.mrf.mxu0  ;;  %v3458_v24 = vpop.f32.mrf.mxu1 }
  0xfd   :  { %v153_v25 = vpop.f32.mrf.mxu0  ;;  %v222_v26 = vpop.f32.mrf.mxu1 }
  0xfe   :  { %v157_v27 = vpack.c.bf16 %v153_v25, %v150_v21  ;;  %v226_v28 = vpack.c.bf16 %v222_v26, %v219_v22 }
  0xff   :  { %v3453_v29 = vpop.f32.mrf.mxu0  ;;  %v3459_v30 = vpop.f32.mrf.mxu1 }
 0x100   :  { %3477 = vmatmul.mubr.bf16.vlgmr.msra.gmra.mxu0 %v226_v28  ;;  %3497 = vmatmul.mubr.bf16.vlgmr.msra.gmra.mxu1 %v157_v27 }
 0x101   :  { %3501 = vmatpush3.bf16.msra.mxu1 %v4293_v2  ;;  %3527 = vmatpush3.bf16.msra.mxu0 %v4293_v2 }
 0x102   :  { %3502 = vmatprep.mubr.msk.bf16.mxu1 %vm4195_vm0, %v4194_v0  ;;  %3528 = vmatprep.mubr.msk.bf16.mxu0 %vm4195_vm0, %v4194_v0 }
 0x103   :  { %3506 = vmatprep.subr.bf16.mxu1 %v4194_v0  ;;  %3532 = vmatprep.subr.bf16.mxu0 %v4194_v0 }
 0x108   :  { %3503 = vmatmul.mubr.msk.bf16.vlgmr.msra.gmra.mxu1 %vm108_vm2, %v3974_v31  ;;  %3529 = vmatmul.mubr.msk.bf16.vlgmr.msra.gmra.mxu0 %vm108_vm2, %v3975_v32 }
 0x109   :  { %3507 = vmatpush3.bf16.msra.mxu1 %v3976_v33  ;;  %3533 = vmatpush3.bf16.msra.mxu0 %v3977_v34 }
 0x10a   :  { %3508 = vmatprep.subr.bf16.mxu1 %v4194_v0  ;;  %3534 = vmatprep.subr.bf16.mxu0 %v4194_v0 }
 0x10b   :  { %3522 = vmatprep.mubr.msk.bf16.mxu1 %vm4195_vm0, %v4194_v0  ;;  %3548 = vmatprep.mubr.msk.bf16.mxu0 %vm4195_vm0, %v4194_v0 }
 0x10d   :  { %3509 = vmatpush3.bf16.msra.mxu1 %v3978_v35  ;;  %3535 = vmatpush3.bf16.msra.mxu0 %v3979_v36  ;;  %v3992_v35 = vld [vmem:[%s4667_s6] sm:$0xff]   ;;  %v4004_v36 = vld [vmem:[#allocation4 + $0x38] sm:$0xff]  }
 0x10e   :  { %3510 = vmatprep.subr.bf16.mxu1 %v4194_v0  ;;  %3536 = vmatprep.subr.bf16.mxu0 %v4194_v0 }
 0x111   :  { %3511 = vmatpush3.bf16.msra.mxu1 %v3980_v37  ;;  %3537 = vmatpush3.bf16.msra.mxu0 %v3981_v38  ;;  %v4005_v37 = vld [vmem:[#allocation4 + $0x30] sm:$0xff]   ;;  %v4006_v38 = vld [vmem:[#allocation4 + $0x28] sm:$0xff]  }
 0x112   :  { %3512 = vmatprep.subr.bf16.mxu1 %v4194_v0  ;;  %3538 = vmatprep.subr.bf16.mxu0 %v4194_v0 }
 0x115   :  { %3513 = vmatpush3.bf16.msra.mxu1 %v3982_v39  ;;  %3539 = vmatpush3.bf16.msra.mxu0 %v3983_v40  ;;  %v4007_v39 = vld [vmem:[#allocation4 + $0x20] sm:$0xff]   ;;  %v4008_v40 = vld [vmem:[#allocation4 + $0x18] sm:$0xff]  }
 0x116   :  { %3514 = vmatprep.subr.bf16.mxu1 %v4194_v0  ;;  %3540 = vmatprep.subr.bf16.mxu0 %v4194_v0 }
 0x119   :  { %3515 = vmatpush3.bf16.msra.mxu1 %v3984_v41  ;;  %3541 = vmatpush3.bf16.msra.mxu0 %v3985_v42  ;;  %v4009_v41 = vld [vmem:[#allocation4 + $0x10] sm:$0xff]  }
 0x11a   :  { %3516 = vmatprep.subr.bf16.mxu1 %v4194_v0  ;;  %3542 = vmatprep.subr.bf16.mxu0 %v4194_v0 }
 0x11d   :  { %3517 = vmatpush3.bf16.msra.mxu1 %v3986_v43  ;;  %3543 = vmatpush3.bf16.msra.mxu0 %v3987_v44 }
 0x11e   :  { %3518 = vmatprep.subr.bf16.mxu1 %v4194_v0  ;;  %3544 = vmatprep.subr.bf16.mxu0 %v4194_v0 }
 0x121   :  { %3519 = vmatpush3.bf16.msra.mxu1 %v3988_v45  ;;  %3545 = vmatpush3.bf16.msra.mxu0 %v3989_v46 }
 0x122   :  { %3520 = vmatprep.subr.bf16.mxu1 %v4194_v0  ;;  %3546 = vmatprep.subr.bf16.mxu0 %v4194_v0 }
 0x125   :  { %3521 = vmatpush3.bf16.msra.mxu1 %v3990_v47  ;;  %3547 = vmatpush3.bf16.msra.mxu0 %v3991_v48 }
 0x126   :  { %3552 = vmatprep.subr.mxu1 %v759_v49  ;;  %3587 = vmatprep.subr.mxu0 %v759_v49 }
 0x1c0   :  { %v326_v50 = vpop.f32.mrf.mxu0  ;;  %v415_v51 = vpop.f32.mrf.mxu1 }
 0x1c1   :  { %v4457_v52 = vadd.f32 %v415_v51, %v326_v50 }
 0x1c2   :  { %v3478_v53 = vpop.f32.mrf.mxu0  ;;  %v3498_v54 = vpop.f32.mrf.mxu1 }
 0x1c4   :  { %v329_v55 = vpop.f32.mrf.mxu0  ;;  %v418_v56 = vpop.f32.mrf.mxu1 }
 0x1c5   :  { %v4459_v57 = vadd.f32 %v418_v56, %v329_v55 }
 0x1c6   :  { %v3479_v58 = vpop.f32.mrf.mxu0  ;;  %v3499_v59 = vpop.f32.mrf.mxu1 }
 0x1c8   :  { %v467_v60 = vpop.f32.mrf.mxu1  ;;  %v628_v61 = vpop.f32.mrf.mxu0 }
 0x1ca   :  { %v3504_v62 = vpop.f32.mrf.mxu1  ;;  %v3530_v63 = vpop.f32.mrf.mxu0 }
 0x1cc   :  { %v470_v0 = vpop.f32.mrf.mxu1  ;;  %v631_v1 = vpop.f32.mrf.mxu0 }
 0x1cd   :  { %v474_v2 = vpack.c.bf16 %v470_v0, %v467_v60  ;;  %v635_v3 = vpack.c.bf16 %v631_v1, %v628_v61 }
 0x1ce   :  { %v3505_v4 = vpop.f32.mrf.mxu1  ;;  %v3531_v5 = vpop.f32.mrf.mxu0 }
 0x1cf   :  { %3523 = vmatmul.mubr.bf16.vlgmr.msra.gmra.mxu1 %v474_v2  ;;  %3549 = vmatmul.mubr.bf16.vlgmr.msra.gmra.mxu0 %v635_v3  ;;  %v3052_v4 = vld [vmem:[%s4665_s4] ss:$0 sm:$0xff] }
 0x1d0   :  { %3553 = vmatpush3.msra.mxu1 %v759_v49  ;;  %3588 = vmatpush3.msra.mxu0 %v759_v49 }
 0x1d1   :  { %3554 = vmatprep.subr.mxu1 %v758_v6  ;;  %3589 = vmatprep.subr.mxu0 %v758_v6 }
 0x1d2   :  { %3555 = vmatpush3.msra.mxu1 %v758_v6  ;;  %3590 = vmatpush3.msra.mxu0 %v758_v6 }
 0x1d3   :  { %3556 = vmatprep.subr.mxu1 %v757_v7  ;;  %3591 = vmatprep.subr.mxu0 %v757_v7 }
 0x1d4   :  { %3557 = vmatpush3.msra.mxu1 %v757_v7  ;;  %3592 = vmatpush3.msra.mxu0 %v757_v7  ;;  %v3053_v7 = vld [vmem:[%s4666_s5] ss:$0 sm:$0xff] }
 0x1d5   :  { %3558 = vmatprep.subr.mxu1 %v756_v8  ;;  %3593 = vmatprep.subr.mxu0 %v756_v8 }
 0x1d6   :  { %3559 = vmatpush3.msra.mxu1 %v756_v8  ;;  %3594 = vmatpush3.msra.mxu0 %v756_v8 }
 0x1d7   :  { %3560 = vmatprep.subr.mxu1 %v755_v9  ;;  %3595 = vmatprep.subr.mxu0 %v755_v9 }
 0x1d8   :  { %3561 = vmatpush3.msra.mxu1 %v755_v9  ;;  %3596 = vmatpush3.msra.mxu0 %v755_v9 }
 0x1d9   :  { %3562 = vmatprep.subr.mxu1 %v754_v10  ;;  %3597 = vmatprep.subr.mxu0 %v754_v10 }
 0x1da   :  { %3563 = vmatpush3.msra.mxu1 %v754_v10  ;;  %3598 = vmatpush3.msra.mxu0 %v754_v10 }
 0x1db   :  { %3564 = vmatprep.subr.mxu1 %v753_v11  ;;  %3599 = vmatprep.subr.mxu0 %v753_v11 }
 0x1dc   :  { %3565 = vmatpush3.msra.mxu1 %v753_v11  ;;  %3600 = vmatpush3.msra.mxu0 %v753_v11 }
 0x1dd   :  { %3566 = vmatprep.subr.mxu1 %v752_v12  ;;  %3601 = vmatprep.subr.mxu0 %v752_v12 }
 0x1de   :  { %3567 = vmatpush3.msra.mxu1 %v752_v12  ;;  %3602 = vmatpush3.msra.mxu0 %v752_v12 }
 0x1df   :  { %3568 = vmatprep.subr.mxu1 %v751_v13  ;;  %3603 = vmatprep.subr.mxu0 %v751_v13 }
 0x1e0   :  { %3569 = vmatpush3.msra.mxu1 %v751_v13  ;;  %3604 = vmatpush3.msra.mxu0 %v751_v13 }
 0x1e1   :  { %3570 = vmatprep.subr.mxu1 %v750_v14  ;;  %3605 = vmatprep.subr.mxu0 %v750_v14 }
 0x1e2   :  { %3571 = vmatpush3.msra.mxu1 %v750_v14  ;;  %3606 = vmatpush3.msra.mxu0 %v750_v14 }
 0x1e3   :  { %3572 = vmatprep.subr.mxu1 %v749_v15  ;;  %3607 = vmatprep.subr.mxu0 %v749_v15 }
 0x1e4   :  { %3573 = vmatpush3.msra.mxu1 %v749_v15  ;;  %3608 = vmatpush3.msra.mxu0 %v749_v15  ;;  %v3993_v15 = vld [vmem:[%s4667_s6 + $0x8] sm:$0xff]  }
 0x1e5   :  { %3574 = vmatprep.subr.mxu1 %v748_v16  ;;  %3609 = vmatprep.subr.mxu0 %v748_v16 }
 0x1e6   :  { %3575 = vmatpush3.msra.mxu1 %v748_v16  ;;  %3610 = vmatpush3.msra.mxu0 %v748_v16  ;;  %v3994_v16 = vld [vmem:[%s4667_s6 + $0x10] sm:$0xff]  }
 0x1e7   :  { %3576 = vmatprep.subr.mxu1 %v747_v17  ;;  %3611 = vmatprep.subr.mxu0 %v747_v17 }
 0x1e8   :  { %3577 = vmatpush3.msra.mxu1 %v747_v17  ;;  %3612 = vmatpush3.msra.mxu0 %v747_v17  ;;  %v3995_v17 = vld [vmem:[#allocation4 + $0x78] sm:$0xff]  }
 0x1e9   :  { %3578 = vmatprep.subr.mxu1 %v746_v18  ;;  %3613 = vmatprep.subr.mxu0 %v746_v18 }
 0x1ea   :  { %3579 = vmatpush3.msra.mxu1 %v746_v18  ;;  %3614 = vmatpush3.msra.mxu0 %v746_v18  ;;  %v3996_v18 = vld [vmem:[%s4667_s6 + $0x18] sm:$0xff]  }
 0x1eb   :  { %3580 = vmatprep.subr.mxu1 %v745_v19  ;;  %3615 = vmatprep.subr.mxu0 %v745_v19 }
 0x1ec   :  { %3581 = vmatpush3.msra.mxu1 %v745_v19  ;;  %3616 = vmatpush3.msra.mxu0 %v745_v19  ;;  %v3997_v19 = vld [vmem:[#allocation4 + $0x70] sm:$0xff]  }
 0x1ed   :  { %3582 = vmatprep.subr.mxu1 %v744_v20  ;;  %3617 = vmatprep.subr.mxu0 %v744_v20 }
 0x1ee   :  { %3583 = vmatpush3.msra.mxu1 %v744_v20  ;;  %3618 = vmatpush3.msra.mxu0 %v744_v20  ;;  %v3998_v20 = vld [vmem:[#allocation4 + $0x68] sm:$0xff]  }
 0x1ef   :  { %3654 = vmatprep.subr.bf16.mxu0 %v4004_v36 }
 0x28f   :  { %v574_v21 = vpop.f32.mrf.mxu1  ;;  %v735_v22 = vpop.f32.mrf.mxu0 }
 0x290   :  { %v581_v23 = vadd.f32 %v574_v21, %v4457_v52  ;;  %v3999_v21 = vld [vmem:[#allocation4 + $0x60] sm:$0xff]  }
 0x291   :  { %v3524_v24 = vpop.f32.mrf.mxu1  ;;  %v3550_v25 = vpop.f32.mrf.mxu0 }
 0x292   :  { %v4462_v26 = vadd.f32 %v735_v22, %v581_v23  ;;  %v4000_v22 = vld [vmem:[#allocation4 + $0x58] sm:$0xff]   ;;  %v4001_v23 = vld [vmem:[#allocation4 + $0x50] sm:$0xff]   ;;  %v4002_v24 = vld [vmem:[#allocation4 + $0x48] sm:$0xff]  }
 0x293   :  { %v577_v27 = vpop.f32.mrf.mxu1  ;;  %v738_v28 = vpop.f32.mrf.mxu0  ;;  %v4003_v25 = vld [vmem:[#allocation4 + $0x40] sm:$0xff]  }
 0x294   :  { %v582_v29 = vadd.f32 %v577_v27, %v4459_v57  ;;  %3584 = vmatprep.mubr.f32.mxu1 %v4462_v26  ;;  %v844_v30 = vmul.f32 %v4462_v26, %v4462_v26  ;;  %v4011_v27 = vld [vmem:[#allocation4] sm:$0xff]  }
 0x295   :  { %v3525_v31 = vpop.f32.mrf.mxu1  ;;  %v3551_v32 = vpop.f32.mrf.mxu0 }
 0x296   :  { %v743_v33 = vadd.f32 %v738_v28, %v582_v29  ;;  %3619 = vmatprep.mubr.f32.mxu0 %v844_v30  ;;  %v4016_v28 = vld [vmem:[#allocation4 + $0xb8] sm:$0xff]  }
 0x298   :  { %v845_v34 = vmul.f32 %v743_v33, %v743_v33  ;;  %3585 = vmatmul.mubr.f32.vlgmr.msra.gmra.mxu1 %v743_v33 }
 0x299   :  { %3624 = vmatprep.mubr.msk.bf16.mxu1 %vm972_vm3, %v3992_v35 }
 0x29a   :  { %3620 = vmatmul.mubr.f32.vlgmr.msra.gmra.mxu0 %v845_v34 }
 0x29b   :  { %3655 = vmatpush3.bf16.msra.mxu0 %v4004_v36  ;;  %v4017_v36 = vld [vmem:[#allocation4 + $0xb0] sm:$0xff]  }
 0x29c   :  { %3656 = vmatprep.subr.bf16.mxu0 %v4005_v37 }
 0x29f   :  { %3657 = vmatpush3.bf16.msra.mxu0 %v4005_v37 }
 0x2a0   :  { %3658 = vmatprep.subr.bf16.mxu0 %v4006_v38 }
 0x2a3   :  { %3659 = vmatpush3.bf16.msra.mxu0 %v4006_v38 }
 0x2a4   :  { %3660 = vmatprep.subr.bf16.mxu0 %v4007_v39 }
 0x2a7   :  { %3661 = vmatpush3.bf16.msra.mxu0 %v4007_v39 }
 0x2a8   :  { %3662 = vmatprep.subr.bf16.mxu0 %v4008_v40 }
 0x2ab   :  { %3663 = vmatpush3.bf16.msra.mxu0 %v4008_v40 }
 0x2ac   :  { %3664 = vmatprep.subr.bf16.mxu0 %v4009_v41 }
 0x2af   :  { %3665 = vmatpush3.bf16.msra.mxu0 %v4009_v41  ;;  %v4012_v41 = vld [vmem:[%s4667_s6 + $0x20] sm:$0xff]  }
 0x358   :  { %v3586_v42 = vpop.f32.mrf.mxu1 }
 0x35a   :  { %v826_v43 = vpop.f32.mrf.mxu1  ;;  %v3621_v44 = vpop.f32.mrf.mxu0 }
 0x35b   :  { %v835_v45 = vadd.f32 %v3586_v42, %v826_v43  ;;  %v4013_v43 = vld [vmem:[%s4667_s6 + $0x28] sm:$0xff]  }
 0x35c   :  { %v912_v46 = vpop.f32.mrf.mxu0 }
 0x35d   :  { %v836_v47 = vrot.slane %v835_v45, 4  ;;  %v921_v48 = vadd.f32 %v3621_v44, %v912_v46  ;;  %v4014_v44 = vld [vmem:[%s4667_s6 + $0x30] sm:$0xff]   ;;  %v4018_v46 = vld [vmem:[#allocation4 + $0xa8] sm:$0xff]  }
 0x35f   :  { %v837_v49 = vadd.f32 %v836_v47, %v835_v45  ;;  %v922_v50 = vrot.slane %v921_v48, 4  ;;  %v4015_v45 = vld [vmem:[%s4667_s6 + $0x38] sm:$0xff]  }
 0x360   :  { %v4019_v47 = vld [vmem:[#allocation4 + $0xf8] sm:$0xff]  }
 0x361   :  { %v838_v51 = vrot.slane %v837_v49, 2  ;;  %v923_v52 = vadd.f32 %v922_v50, %v921_v48  ;;  %v4020_v48 = vld [vmem:[#allocation4 + $0xa0] sm:$0xff]   ;;  %v4022_v50 = vld [vmem:[#allocation4 + $0x98] sm:$0xff]  }
 0x363   :  { %v839_v53 = vadd.f32 %v838_v51, %v837_v49  ;;  %v924_v54 = vrot.slane %v923_v52, 2  ;;  %v4021_v49 = vld [vmem:[#allocation4 + $0xf0] sm:$0xff]   ;;  %v4023_v51 = vld [vmem:[#allocation4 + $0xe8] sm:$0xff]  }
 0x365   :  { %v840_v55 = vrot.slane %v839_v53, 1  ;;  %v925_v56 = vadd.f32 %v924_v54, %v923_v52  ;;  %v4024_v52 = vld [vmem:[#allocation4 + $0x90] sm:$0xff]   ;;  %v4026_v54 = vld [vmem:[#allocation4 + $0x88] sm:$0xff]  }
 0x367   :  { %v841_v57 = vadd.f32 %v840_v55, %v839_v53  ;;  %v926_v58 = vrot.slane %v925_v56, 1  ;;  %v4025_v53 = vld [vmem:[#allocation4 + $0xe0] sm:$0xff]   ;;  %v4027_v55 = vld [vmem:[#allocation4 + $0xd8] sm:$0xff]  }
 0x369   :  { %v843_v59 = vmul.f32 0.0625, %v841_v57  ;;  %v927_v60 = vadd.f32 %v926_v58, %v925_v56  ;;  %v4028_v56 = vld [vmem:[#allocation4 + $0x80] sm:$0xff]   ;;  %v4029_v57 = vld [vmem:[#allocation4 + $0xd0] sm:$0xff]   ;;  %v4030_v58 = vld [vmem:[#allocation4 + $0xc8] sm:$0xff]  }
 0x36b   :  { %v928_v61 = vmul.f32 0.0625, %v927_v60  ;;  %v929_v62 = vmul.f32 %v843_v59, %v843_v59  ;;  %v931_v1 = vsub.f32 %v4462_v26, %v843_v59  ;;  %v932_v2 = vsub.f32 %v743_v33, %v843_v59  ;;  %v4010_v26 = vld [vmem:[#allocation4 + $0x8] sm:$0xff]   ;;  %v4031_v59 = vld [vmem:[#allocation4 + $0xc0] sm:$0xff]   ;;  %v1724_v60 = vld [vmem:[#allocation6 + $0x78] sm:$0xff] }
 0x36c   :  { %3666 = vmatprep.subr.bf16.mxu0 %v4010_v26 }
 0x36d   :  { %v930_v63 = vsub.f32 %v928_v61, %v929_v62  ;;  %3667 = vmatpush3.bf16.msra.mxu0 %v4010_v26  ;;  %v1710_v26 = vld [vmem:[#allocation6 + $0x8] sm:$0xff] }
 0x36e   :  { %3668 = vmatprep.subr.bf16.mxu0 %v4011_v27 }
 0x36f   :  { %v933_v0 = vadd.f32 1e-05, %v930_v63 }
 0x371   :  { %4080 = vrsqrt.f32 %v933_v0  ;;  %3669 = vmatpush3.bf16.msra.mxu0 %v4011_v27  ;;  %v1709_v27 = vld [vmem:[#allocation6] sm:$0xff] }
 0x372   :  { %3680 = vmatprep.subr.bf16.mxu0 %v4016_v28 }
 0x37e   :  { %v4081_v3 = vpop.eup %4080 }
 0x37f   :  { %v935_v5 = vmul.f32 %v4081_v3, %v931_v1  ;;  %v936_v6 = vmul.f32 %v4081_v3, %v932_v2 }
 0x381   :  { %v944_v8 = vmul.f32 %v3052_v4, %v935_v5  ;;  %v945_v9 = vmul.f32 %v3052_v4, %v936_v6 }
 0x383   :  { %v953_v10 = vadd.f32 %v3053_v7, %v944_v8  ;;  %v954_v11 = vadd.f32 %v3053_v7, %v945_v9  ;;  %v1723_v8 = vld [vmem:[#allocation6 + $0x70] sm:$0xff] }
 0x385   :  { %v955_v12 = vmax.f32 %v953_v10, 0.0  ;;  %v956_v13 = vmax.f32 %v954_v11, 0.0  ;;  %v1722_v10 = vld [vmem:[#allocation6 + $0x68] sm:$0xff] }
 0x387   :  { %v4479_v14 = vpack.c.bf16 %v956_v13, %v955_v12  ;;  %v1721_v12 = vld [vmem:[#allocation6 + $0x60] sm:$0xff] }
 0x389   :  { %3622 = vmatprep.subr.bf16.mxu1 %v4479_v14 }
 0x38a   :  { %3623 = vmatpush3.bf16.msra.mxu1 %v4479_v14 }
 0x38b   :  { %3628 = vmatprep.subr.bf16.mxu1 %v4479_v14 }
 0x38d   :  { %3625 = vmatmul.mubr.msk.bf16.vlgmr.msra.gmra.mxu1 %vm972_vm3, %v3993_v15  ;;  %v1720_v15 = vld [vmem:[#allocation6 + $0x58] sm:$0xff] }
 0x38e   :  { %3629 = vmatpush3.bf16.msra.mxu1 %v4479_v14  ;;  %3630 = vmatprep.mubr.msk.bf16.mxu1 %vm972_vm3, %v3994_v16 }
 0x38f   :  { %3634 = vmatprep.subr.bf16.mxu1 %v3995_v17 }
 0x395   :  { %3631 = vmatmul.mubr.msk.bf16.vlgmr.msra.gmra.mxu1 %vm972_vm3, %v3996_v18  ;;  %v1718_v18 = vld [vmem:[#allocation6 + $0x48] sm:$0xff] }
 0x396   :  { %3635 = vmatpush3.bf16.msra.mxu1 %v3995_v17  ;;  %v1719_v17 = vld [vmem:[#allocation6 + $0x50] sm:$0xff] }
 0x397   :  { %3636 = vmatprep.subr.bf16.mxu1 %v3997_v19 }
 0x39a   :  { %3637 = vmatpush3.bf16.msra.mxu1 %v3997_v19  ;;  %v1717_v19 = vld [vmem:[#allocation6 + $0x40] sm:$0xff] }
 0x39b   :  { %3638 = vmatprep.subr.bf16.mxu1 %v3998_v20 }
 0x39e   :  { %3639 = vmatpush3.bf16.msra.mxu1 %v3998_v20  ;;  %v1716_v20 = vld [vmem:[#allocation6 + $0x38] sm:$0xff] }
 0x39f   :  { %3640 = vmatprep.subr.bf16.mxu1 %v3999_v21 }
 0x3a2   :  { %3641 = vmatpush3.bf16.msra.mxu1 %v3999_v21  ;;  %v1715_v21 = vld [vmem:[#allocation6 + $0x30] sm:$0xff] }
 0x3a3   :  { %3642 = vmatprep.subr.bf16.mxu1 %v4000_v22 }
 0x3a6   :  { %3643 = vmatpush3.bf16.msra.mxu1 %v4000_v22  ;;  %v1714_v22 = vld [vmem:[#allocation6 + $0x28] sm:$0xff] }
 0x3a7   :  { %3644 = vmatprep.subr.bf16.mxu1 %v4001_v23 }
 0x3aa   :  { %3645 = vmatpush3.bf16.msra.mxu1 %v4001_v23  ;;  %v1713_v23 = vld [vmem:[#allocation6 + $0x20] sm:$0xff] }
 0x3ab   :  { %3646 = vmatprep.subr.bf16.mxu1 %v4002_v24 }
 0x3ae   :  { %3647 = vmatpush3.bf16.msra.mxu1 %v4002_v24  ;;  %v1712_v24 = vld [vmem:[#allocation6 + $0x18] sm:$0xff] }
 0x3af   :  { %3648 = vmatprep.subr.bf16.mxu1 %v4003_v25 }
 0x3b2   :  { %3649 = vmatpush3.bf16.msra.mxu1 %v4003_v25  ;;  %v1711_v25 = vld [vmem:[#allocation6 + $0x10] sm:$0xff] }
 0x3b3   :  { %3674 = vmatprep.subr.bf16.mxu1 %v4479_v14 }
 0x44d   :  { %v3626_v29 = vpop.f32.mrf.mxu1 }
 0x44f   :  { %v1013_v30 = vpop.f32.mrf.mxu1 }
 0x451   :  { %v3627_v31 = vpop.f32.mrf.mxu1 }
 0x452   :  { %v1029_v34 = vpack.c.bf16 %v3627_v31, %v3626_v29 }
 0x453   :  { %v1016_v32 = vpop.f32.mrf.mxu1 }
 0x454   :  { %v1028_v33 = vpack.c.bf16 %v1016_v32, %v1013_v30 }
 0x455   :  { %v3632_v35 = vpop.f32.mrf.mxu1 }
 0x456   :  { %3670 = vmatprep.mubr.bf16.mxu0 %v1028_v33 }
 0x457   :  { %v1101_v37 = vpop.f32.mrf.mxu1  ;;  %3671 = vmatmul.mubr.bf16.vlgmr.msra.gmra.mxu0 %v1029_v34 }
 0x458   :  { %3681 = vmatpush3.bf16.msra.mxu0 %v4016_v28 }
 0x459   :  { %v3633_v38 = vpop.f32.mrf.mxu1  ;;  %3682 = vmatprep.subr.bf16.mxu0 %v4017_v36 }
 0x45a   :  { %v1117_v42 = vpack.c.bf16 %v3633_v38, %v3632_v35 }
 0x45b   :  { %v1104_v39 = vpop.f32.mrf.mxu1 }
 0x45c   :  { %v1116_v40 = vpack.c.bf16 %v1104_v39, %v1101_v37  ;;  %3683 = vmatpush3.bf16.msra.mxu0 %v4017_v36 }
 0x45d   :  { %3684 = vmatprep.subr.bf16.mxu0 %v4018_v46 }
 0x45e   :  { %3650 = vmatprep.mubr.bf16.mxu1 %v1116_v40 }
 0x45f   :  { %3651 = vmatmul.mubr.bf16.vlgmr.msra.gmra.mxu1 %v1117_v42 }
 0x460   :  { %3675 = vmatpush3.bf16.msra.mxu1 %v4479_v14  ;;  %3676 = vmatprep.mubr.msk.bf16.mxu1 %vm972_vm3, %v4012_v41 }
 0x461   :  { %3700 = vmatprep.subr.bf16.mxu1 %v4479_v14  ;;  %3685 = vmatpush3.bf16.msra.mxu0 %v4018_v46 }
 0x462   :  { %3686 = vmatprep.subr.bf16.mxu0 %v4020_v48 }
 0x465   :  { %3687 = vmatpush3.bf16.msra.mxu0 %v4020_v48 }
 0x466   :  { %3688 = vmatprep.subr.bf16.mxu0 %v4022_v50 }
 0x467   :  { %3677 = vmatmul.mubr.msk.bf16.vlgmr.msra.gmra.mxu1 %vm972_vm3, %v4013_v43 }
 0x468   :  { %3701 = vmatpush3.bf16.msra.mxu1 %v4479_v14  ;;  %3702 = vmatprep.mubr.msk.bf16.mxu1 %vm972_vm3, %v4014_v44 }
 0x469   :  { %3706 = vmatprep.subr.bf16.mxu1 %v4019_v47  ;;  %3689 = vmatpush3.bf16.msra.mxu0 %v4022_v50 }
 0x46a   :  { %3690 = vmatprep.subr.bf16.mxu0 %v4024_v52 }
 0x46d   :  { %3691 = vmatpush3.bf16.msra.mxu0 %v4024_v52 }
 0x46e   :  { %3692 = vmatprep.subr.bf16.mxu0 %v4026_v54 }
 0x46f   :  { %3703 = vmatmul.mubr.msk.bf16.vlgmr.msra.gmra.mxu1 %vm972_vm3, %v4015_v45 }
 0x470   :  { %3707 = vmatpush3.bf16.msra.mxu1 %v4019_v47 }
 0x471   :  { %3708 = vmatprep.subr.bf16.mxu1 %v4021_v49  ;;  %3693 = vmatpush3.bf16.msra.mxu0 %v4026_v54 }
 0x472   :  { %3694 = vmatprep.subr.bf16.mxu0 %v4028_v56 }
 0x474   :  { %3709 = vmatpush3.bf16.msra.mxu1 %v4021_v49 }
 0x475   :  { %3710 = vmatprep.subr.bf16.mxu1 %v4023_v51  ;;  %3695 = vmatpush3.bf16.msra.mxu0 %v4028_v56  ;;  %v4032_v56 = vld [vmem:[%s4672_s11] sm:$0xff]  }
 0x476   :  { %3726 = vmatprep.subr.mxu0 %v1724_v60 }
 0x478   :  { %3711 = vmatpush3.bf16.msra.mxu1 %v4023_v51 }
 0x479   :  { %3712 = vmatprep.subr.bf16.mxu1 %v4025_v53 }
 0x47c   :  { %3713 = vmatpush3.bf16.msra.mxu1 %v4025_v53 }
 0x47d   :  { %3714 = vmatprep.subr.bf16.mxu1 %v4027_v55 }
 0x480   :  { %3715 = vmatpush3.bf16.msra.mxu1 %v4027_v55 }
 0x481   :  { %3716 = vmatprep.subr.bf16.mxu1 %v4029_v57 }
 0x484   :  { %3717 = vmatpush3.bf16.msra.mxu1 %v4029_v57  ;;  %v4033_v57 = vld [vmem:[%s4672_s11 + $0x20] sm:$0xff]  }
 0x485   :  { %3718 = vmatprep.subr.bf16.mxu1 %v4030_v58 }
 0x488   :  { %3719 = vmatpush3.bf16.msra.mxu1 %v4030_v58 }
 0x489   :  { %3720 = vmatprep.subr.bf16.mxu1 %v4031_v59 }
 0x48c   :  { %3721 = vmatpush3.bf16.msra.mxu1 %v4031_v59 }
 0x48d   :  { %3764 = vmatprep.subr.mxu1 %v1724_v60 }
 0x517   :  { %v3672_v28 = vpop.f32.mrf.mxu0 }
 0x519   :  { %v1314_v29 = vpop.f32.mrf.mxu0 }
 0x51b   :  { %v3673_v30 = vpop.f32.mrf.mxu0 }
 0x51d   :  { %v1317_v31 = vpop.f32.mrf.mxu0 }
 0x51f   :  { %v4517_v61 = vpop.f32.mrf.mxu1 }
 0x520   :  { %v1323_v38 = vadd.f32 %v3672_v28, %v4517_v61 }
 0x521   :  { %v4519_v62 = vpop.f32.mrf.mxu1 }
 0x522   :  { %v1315_v35 = vadd.f32 %v1314_v29, %v4519_v62 }
 0x523   :  { %v4521_v63 = vpop.f32.mrf.mxu1 }
 0x524   :  { %v1326_v45 = vadd.f32 %v3673_v30, %v4521_v63  ;;  %v3114_v30 = vld [vmem:[%s4670_s9] ss:$0 sm:$0xff] }
 0x525   :  { %v4523_v0 = vpop.f32.mrf.mxu1 }
 0x526   :  { %v1318_v41 = vadd.f32 %v1317_v31, %v4523_v0 }
 0x527   :  { %v3678_v1 = vpop.f32.mrf.mxu1 }
 0x529   :  { %v1384_v2 = vpop.f32.mrf.mxu1 }
 0x52b   :  { %v3679_v3 = vpop.f32.mrf.mxu1 }
 0x52c   :  { %v1400_v6 = vpack.c.bf16 %v3679_v3, %v3678_v1 }
 0x52d   :  { %v1387_v4 = vpop.f32.mrf.mxu1 }
 0x52e   :  { %v1399_v5 = vpack.c.bf16 %v1387_v4, %v1384_v2 }
 0x52f   :  { %v3704_v7 = vpop.f32.mrf.mxu1 }
 0x530   :  { %3696 = vmatprep.mubr.bf16.mxu0 %v1399_v5 }
 0x531   :  { %3697 = vmatmul.mubr.bf16.vlgmr.msra.gmra.mxu0 %v1400_v6  ;;  %v1574_v9 = vpop.f32.mrf.mxu1 }
 0x532   :  { %3727 = vmatpush3.msra.mxu0 %v1724_v60 }
 0x533   :  { %v3705_v11 = vpop.f32.mrf.mxu1  ;;  %3728 = vmatprep.subr.mxu0 %v1723_v8 }
 0x534   :  { %3729 = vmatpush3.msra.mxu0 %v1723_v8  ;;  %v1590_v16 = vpack.c.bf16 %v3705_v11, %v3704_v7 }
 0x535   :  { %v1577_v13 = vpop.f32.mrf.mxu1  ;;  %3730 = vmatprep.subr.mxu0 %v1722_v10 }
 0x536   :  { %v1589_v14 = vpack.c.bf16 %v1577_v13, %v1574_v9  ;;  %3731 = vmatpush3.msra.mxu0 %v1722_v10 }
 0x537   :  { %3732 = vmatprep.subr.mxu0 %v1721_v12 }
 0x538   :  { %3722 = vmatprep.mubr.bf16.mxu1 %v1589_v14  ;;  %3733 = vmatpush3.msra.mxu0 %v1721_v12 }
 0x539   :  { %3723 = vmatmul.mubr.bf16.vlgmr.msra.gmra.mxu1 %v1590_v16  ;;  %3734 = vmatprep.subr.mxu0 %v1720_v15 }
 0x53a   :  { %3765 = vmatpush3.msra.mxu1 %v1724_v60  ;;  %3735 = vmatpush3.msra.mxu0 %v1720_v15 }
 0x53b   :  { %3766 = vmatprep.subr.mxu1 %v1723_v8  ;;  %3736 = vmatprep.subr.mxu0 %v1719_v17 }
 0x53c   :  { %3767 = vmatpush3.msra.mxu1 %v1723_v8  ;;  %3737 = vmatpush3.msra.mxu0 %v1719_v17 }
 0x53d   :  { %3768 = vmatprep.subr.mxu1 %v1722_v10  ;;  %3738 = vmatprep.subr.mxu0 %v1718_v18 }
 0x53e   :  { %3769 = vmatpush3.msra.mxu1 %v1722_v10  ;;  %3739 = vmatpush3.msra.mxu0 %v1718_v18 }
 0x53f   :  { %3770 = vmatprep.subr.mxu1 %v1721_v12  ;;  %3740 = vmatprep.subr.mxu0 %v1717_v19 }
 0x540   :  { %3771 = vmatpush3.msra.mxu1 %v1721_v12  ;;  %3741 = vmatpush3.msra.mxu0 %v1717_v19 }
 0x541   :  { %3772 = vmatprep.subr.mxu1 %v1720_v15  ;;  %3742 = vmatprep.subr.mxu0 %v1716_v20 }
 0x542   :  { %3773 = vmatpush3.msra.mxu1 %v1720_v15  ;;  %3743 = vmatpush3.msra.mxu0 %v1716_v20 }
 0x543   :  { %3774 = vmatprep.subr.mxu1 %v1719_v17  ;;  %3744 = vmatprep.subr.mxu0 %v1715_v21 }
 0x544   :  { %3775 = vmatpush3.msra.mxu1 %v1719_v17  ;;  %3745 = vmatpush3.msra.mxu0 %v1715_v21 }
 0x545   :  { %3776 = vmatprep.subr.mxu1 %v1718_v18  ;;  %3746 = vmatprep.subr.mxu0 %v1714_v22 }
 0x546   :  { %3777 = vmatpush3.msra.mxu1 %v1718_v18  ;;  %3747 = vmatpush3.msra.mxu0 %v1714_v22 }
 0x547   :  { %3778 = vmatprep.subr.mxu1 %v1717_v19  ;;  %3748 = vmatprep.subr.mxu0 %v1713_v23 }
 0x548   :  { %3779 = vmatpush3.msra.mxu1 %v1717_v19  ;;  %3749 = vmatpush3.msra.mxu0 %v1713_v23 }
 0x549   :  { %3780 = vmatprep.subr.mxu1 %v1716_v20  ;;  %3750 = vmatprep.subr.mxu0 %v1712_v24 }
 0x54a   :  { %3781 = vmatpush3.msra.mxu1 %v1716_v20  ;;  %3751 = vmatpush3.msra.mxu0 %v1712_v24 }
 0x54b   :  { %3782 = vmatprep.subr.mxu1 %v1715_v21  ;;  %3752 = vmatprep.subr.mxu0 %v1711_v25 }
 0x54c   :  { %3783 = vmatpush3.msra.mxu1 %v1715_v21  ;;  %3753 = vmatpush3.msra.mxu0 %v1711_v25 }
 0x54d   :  { %3784 = vmatprep.subr.mxu1 %v1714_v22  ;;  %3754 = vmatprep.subr.mxu0 %v1710_v26 }
 0x54e   :  { %3785 = vmatpush3.msra.mxu1 %v1714_v22  ;;  %3755 = vmatpush3.msra.mxu0 %v1710_v26 }
 0x54f   :  { %3786 = vmatprep.subr.mxu1 %v1713_v23  ;;  %3756 = vmatprep.subr.mxu0 %v1709_v27 }
 0x550   :  { %3787 = vmatpush3.msra.mxu1 %v1713_v23  ;;  %3757 = vmatpush3.msra.mxu0 %v1709_v27 }
 0x551   :  { %3788 = vmatprep.subr.mxu1 %v1712_v24 }
 0x552   :  { %3789 = vmatpush3.msra.mxu1 %v1712_v24 }
 0x553   :  { %3790 = vmatprep.subr.mxu1 %v1711_v25 }
 0x554   :  { %3791 = vmatpush3.msra.mxu1 %v1711_v25 }
 0x555   :  { %3792 = vmatprep.subr.mxu1 %v1710_v26 }
 0x556   :  { %3793 = vmatpush3.msra.mxu1 %v1710_v26 }
 0x557   :  { %3794 = vmatprep.subr.mxu1 %v1709_v27 }
 0x558   :  { %3795 = vmatpush3.msra.mxu1 %v1709_v27 }
 0x5f1   :  { %v3698_v32 = vpop.f32.mrf.mxu0 }
 0x5f2   :  { %v1517_v43 = vadd.f32 %v3698_v32, %v1323_v38 }
 0x5f3   :  { %v1500_v33 = vpop.f32.mrf.mxu0 }
 0x5f4   :  { %v1515_v37 = vadd.f32 %v1500_v33, %v1315_v35  ;;  %v3115_v35 = vld [vmem:[%s4671_s10] ss:$0 sm:$0xff] }
 0x5f5   :  { %v3699_v34 = vpop.f32.mrf.mxu0 }
 0x5f6   :  { %v1518_v50 = vadd.f32 %v3699_v34, %v1326_v45 }
 0x5f7   :  { %v1503_v39 = vpop.f32.mrf.mxu0 }
 0x5f8   :  { %v1516_v46 = vadd.f32 %v1503_v39, %v1318_v41 }
 0x5f9   :  { %v3724_v36 = vpop.f32.mrf.mxu1 }
 0x5fa   :  { %v1707_v48 = vadd.f32 %v3724_v36, %v1517_v43 }
 0x5fb   :  { %v1690_v40 = vpop.f32.mrf.mxu1 }
 0x5fc   :  { %v4528_v42 = vadd.f32 %v1690_v40, %v1515_v37  ;;  %v1823_v54 = vmul.f32 %v1707_v48, %v1707_v48 }
 0x5fd   :  { %v3725_v44 = vpop.f32.mrf.mxu1 }
 0x5fe   :  { %3758 = vmatprep.mubr.f32.mxu0 %v4528_v42  ;;  %v1821_v47 = vmul.f32 %v4528_v42, %v4528_v42  ;;  %v1708_v52 = vadd.f32 %v3725_v44, %v1518_v50  ;;  %v4036_v50 = vld [vmem:[#allocation7 + $0x78] sm:$0xff]  }
 0x5ff   :  { %v1693_v49 = vpop.f32.mrf.mxu1 }
 0x600   :  { %v1706_v51 = vadd.f32 %v1693_v49, %v1516_v46  ;;  %3796 = vmatprep.mubr.f32.mxu1 %v1821_v47  ;;  %v1824_v55 = vmul.f32 %v1708_v52, %v1708_v52 }
 0x602   :  { %v1822_v53 = vmul.f32 %v1706_v51, %v1706_v51  ;;  %3759 = vmatmul.mubr.f32.vlgmr.msra.gmra.mxu0 %v1706_v51 }
 0x603   :  { %3761 = vmatprep.mubr.f32.mxu0 %v1707_v48 }
 0x604   :  { %3797 = vmatmul.mubr.f32.vlgmr.msra.gmra.mxu1 %v1822_v53  ;;  %v4035_v53 = vld [vmem:[%s4672_s11 + $0x28] sm:$0xff]  }
 0x605   :  { %3799 = vmatprep.mubr.f32.mxu1 %v1823_v54  ;;  %v4038_v54 = vld [vmem:[%s4672_s11 + $0x10] sm:$0xff]  }
 0x606   :  { %3762 = vmatmul.mubr.f32.gmra.mxu0 %v1708_v52 }
 0x607   :  { %3806 = vmatprep.mubr.msk.bf16.mxu0 %vm1988_vm4, %v4032_v56  ;;  %v4039_v56 = vld [vmem:[%s4672_s11 + $0x30] sm:$0xff]  }
 0x608   :  { %3800 = vmatmul.mubr.f32.gmra.mxu1 %v1824_v55  ;;  %v4037_v55 = vld [vmem:[#allocation7 + $0x70] sm:$0xff]  }
 0x609   :  { %3818 = vmatprep.mubr.msk.bf16.mxu1 %vm1988_vm4, %v4033_v57  ;;  %v4049_v57 = vld [vmem:[#allocation7 + $0x30] sm:$0xff]  }
 0x6c2   :  { %v3760_v58 = vpop.f32.mrf.mxu0 }
 0x6c4   :  { %v1791_v59 = vpop.f32.mrf.mxu0  ;;  %v3798_v60 = vpop.f32.mrf.mxu1 }
 0x6c5   :  { %v1810_v63 = vadd.f32 %v3760_v58, %v1791_v59  ;;  %v4042_v58 = vld [vmem:[#allocation7 + $0x68] sm:$0xff]   ;;  %v4040_v59 = vld [vmem:[%s4672_s11 + $0x18] sm:$0xff]  }
 0x6c6   :  { %v3763_v61 = vpop.f32.mrf.mxu0  ;;  %v1891_v62 = vpop.f32.mrf.mxu1 }
 0x6c7   :  { %v1910_v2 = vadd.f32 %v3798_v60, %v1891_v62  ;;  %v4041_v60 = vld [vmem:[%s4672_s11 + $0x38] sm:$0xff]   ;;  %v4043_v62 = vld [vmem:[#allocation7 + $0x60] sm:$0xff]  }
 0x6c8   :  { %v1801_v0 = vpop.f32.mrf.mxu0  ;;  %v3801_v1 = vpop.f32.mrf.mxu1 }
 0x6c9   :  { %v1811_v3 = vadd.f32 %v1810_v63, %v1801_v0  ;;  %v4051_v63 = vld [vmem:[#allocation7 + $0x20] sm:$0xff]   ;;  %v4044_v0 = vld [vmem:[#allocation7 + $0x58] sm:$0xff]  }
 0x6ca   :  { %v1901_v4 = vpop.f32.mrf.mxu1 }
 0x6cb   :  { %v1812_v5 = vadd.f32 %v3763_v61, %v1811_v3  ;;  %v1911_v6 = vadd.f32 %v1910_v2, %v1901_v4  ;;  %v4050_v61 = vld [vmem:[#allocation7 + $0x28] sm:$0xff]   ;;  %v4045_v2 = vld [vmem:[#allocation7 + $0x50] sm:$0xff]  }
 0x6cc   :  { %v4053_v3 = vld [vmem:[#allocation7 + $0x10] sm:$0xff]   ;;  %v4046_v4 = vld [vmem:[#allocation7 + $0x48] sm:$0xff]  }
 0x6cd   :  { %v1813_v7 = vrot.slane %v1812_v5, 4  ;;  %v1912_v8 = vadd.f32 %v3801_v1, %v1911_v6  ;;  %v4052_v1 = vld [vmem:[#allocation7 + $0x18] sm:$0xff]   ;;  %v4054_v6 = vld [vmem:[#allocation7 + $0x8] sm:$0xff]  }
 0x6cf   :  { %v1814_v9 = vadd.f32 %v1813_v7, %v1812_v5  ;;  %v1913_v10 = vrot.slane %v1912_v8, 4  ;;  %v4047_v5 = vld [vmem:[#allocation7 + $0x40] sm:$0xff]  }
 0x6d0   :  { %v4055_v7 = vld [vmem:[#allocation7] sm:$0xff]  }
 0x6d1   :  { %v1815_v11 = vrot.slane %v1814_v9, 2  ;;  %v1914_v12 = vadd.f32 %v1913_v10, %v1912_v8  ;;  %v4064_v8 = vld [vmem:[#allocation7 + $0xb8] sm:$0xff]  }
 0x6d3   :  { %v1816_v13 = vadd.f32 %v1815_v11, %v1814_v9  ;;  %v1915_v14 = vrot.slane %v1914_v12, 2 }
 0x6d5   :  { %v1817_v15 = vrot.slane %v1816_v13, 1  ;;  %v1916_v16 = vadd.f32 %v1915_v14, %v1914_v12 }
 0x6d7   :  { %v1818_v17 = vadd.f32 %v1817_v15, %v1816_v13  ;;  %v1917_v18 = vrot.slane %v1916_v16, 1 }
 0x6d9   :  { %v1820_v19 = vmul.f32 0.03125, %v1818_v17  ;;  %v1918_v20 = vadd.f32 %v1917_v18, %v1916_v16 }
 0x6db   :  { %v1919_v21 = vmul.f32 0.03125, %v1918_v20  ;;  %v1920_v22 = vmul.f32 %v1820_v19, %v1820_v19  ;;  %v1922_v25 = vsub.f32 %v4528_v42, %v1820_v19  ;;  %v1923_v26 = vsub.f32 %v1706_v51, %v1820_v19  ;;  %v4048_v51 = vld [vmem:[#allocation7 + $0x38] sm:$0xff]  }
 0x6dc   :  { %v1924_v27 = vsub.f32 %v1707_v48, %v1820_v19  ;;  %v1925_v28 = vsub.f32 %v1708_v52, %v1820_v19  ;;  %v4034_v52 = vld [vmem:[%s4672_s11 + $0x8] sm:$0xff]  }
 0x6dd   :  { %v1921_v23 = vsub.f32 %v1919_v21, %v1920_v22 }
 0x6df   :  { %v1926_v24 = vadd.f32 1e-05, %v1921_v23  ;;  %v4065_v23 = vld [vmem:[#allocation7 + $0xb0] sm:$0xff]  }
 0x6e1   :  { %4082 = vrsqrt.f32 %v1926_v24 }
 0x6ee   :  { %v4083_v29 = vpop.eup %4082 }
 0x6ef   :  { %v1930_v31 = vmul.f32 %v4083_v29, %v1924_v27  ;;  %v1931_v32 = vmul.f32 %v4083_v29, %v1925_v28  ;;  %v1928_v33 = vmul.f32 %v4083_v29, %v1922_v25  ;;  %v1929_v34 = vmul.f32 %v4083_v29, %v1923_v26 }
 0x6f1   :  { %v1941_v36 = vmul.f32 %v3114_v30, %v1930_v31  ;;  %v1942_v37 = vmul.f32 %v3114_v30, %v1931_v32  ;;  %v1939_v38 = vmul.f32 %v3114_v30, %v1928_v33  ;;  %v1940_v39 = vmul.f32 %v3114_v30, %v1929_v34  ;;  %v4056_v33 = vld [vmem:[%s4672_s11 + $0x40] sm:$0xff]  }
 0x6f3   :  { %v1952_v40 = vadd.f32 %v3115_v35, %v1941_v36  ;;  %v1953_v41 = vadd.f32 %v3115_v35, %v1942_v37  ;;  %v1950_v42 = vadd.f32 %v3115_v35, %v1939_v38  ;;  %v1951_v43 = vadd.f32 %v3115_v35, %v1940_v39  ;;  %v4057_v35 = vld [vmem:[%s4672_s11 + $0x48] sm:$0xff]   ;;  %v4058_v36 = vld [vmem:[%s4672_s11 + $0x50] sm:$0xff]   ;;  %v4059_v37 = vld [vmem:[%s4672_s11 + $0x58] sm:$0xff]  }
 0x6f4   :  { %v4060_v38 = vld [vmem:[%s4672_s11 + $0x60] sm:$0xff]   ;;  %v4061_v39 = vld [vmem:[%s4672_s11 + $0x68] sm:$0xff]  }
 0x6f5   :  { %v1956_v44 = vmax.f32 %v1952_v40, 0.0  ;;  %v1957_v45 = vmax.f32 %v1953_v41, 0.0  ;;  %v1954_v46 = vmax.f32 %v1950_v42, 0.0  ;;  %v1955_v47 = vmax.f32 %v1951_v43, 0.0  ;;  %v4062_v40 = vld [vmem:[%s4672_s11 + $0x70] sm:$0xff]   ;;  %v4063_v41 = vld [vmem:[%s4672_s11 + $0x78] sm:$0xff]  }
 0x6f6   :  { %v4066_v42 = vld [vmem:[#allocation7 + $0xa8] sm:$0xff]   ;;  %v4067_v43 = vld [vmem:[#allocation7 + $0xa0] sm:$0xff]  }
 0x6f7   :  { %v4549_v48 = vpack.c.bf16 %v1957_v45, %v1956_v44  ;;  %v4553_v49 = vpack.c.bf16 %v1955_v47, %v1954_v46  ;;  %v4068_v44 = vld [vmem:[#allocation7 + $0x98] sm:$0xff]   ;;  %v4070_v46 = vld [vmem:[#allocation7 + $0x90] sm:$0xff]  }
 0x6f8   :  { %v4069_v45 = vld [vmem:[#allocation7 + $0xf8] sm:$0xff]   ;;  %v4071_v47 = vld [vmem:[#allocation7 + $0xf0] sm:$0xff]  }
 0x6f9   :  { %3802 = vmatprep.subr.bf16.mxu0 %v4549_v48  ;;  %3814 = vmatprep.subr.bf16.mxu1 %v4549_v48 }
 0x6fa   :  { %3803 = vmatpush3.bf16.msra.mxu0 %v4549_v48  ;;  %3815 = vmatpush3.bf16.msra.mxu1 %v4549_v48 }
 0x6fb   :  { %3804 = vmatprep.subr.bf16.mxu0 %v4553_v49  ;;  %3816 = vmatprep.subr.bf16.mxu1 %v4553_v49 }
 0x6fe   :  { %3805 = vmatpush3.bf16.msra.mxu0 %v4553_v49  ;;  %3817 = vmatpush3.bf16.msra.mxu1 %v4553_v49 }
 0x6ff   :  { %3826 = vmatprep.subr.bf16.mxu0 %v4036_v50  ;;  %3850 = vmatprep.subr.bf16.mxu1 %v4048_v51 }
 0x701   :  { %3807 = vmatmul.mubr.msk.bf16.vlgmr.msra.gmra.mxu0 %vm1988_vm4, %v4034_v52  ;;  %3819 = vmatmul.mubr.msk.bf16.vlgmr.msra.gmra.mxu1 %vm1988_vm4, %v4035_v53  ;;  %v4076_v52 = vld [vmem:[#allocation7 + $0xd8] sm:$0xff]   ;;  %v4077_v53 = vld [vmem:[#allocation7 + $0xd0] sm:$0xff]  }
 0x702   :  { %3827 = vmatpush3.bf16.msra.mxu0 %v4036_v50  ;;  %3810 = vmatprep.mubr.msk.bf16.mxu0 %vm1988_vm4, %v4038_v54  ;;  %v4074_v50 = vld [vmem:[#allocation7 + $0x80] sm:$0xff]   ;;  %v4078_v54 = vld [vmem:[#allocation7 + $0xc8] sm:$0xff]  }
 0x703   :  { %3828 = vmatprep.subr.bf16.mxu0 %v4037_v55  ;;  %3822 = vmatprep.mubr.msk.bf16.mxu1 %vm1988_vm4, %v4039_v56 }
 0x704   :  { %3851 = vmatpush3.bf16.msra.mxu1 %v4048_v51  ;;  %v4075_v51 = vld [vmem:[#allocation7 + $0xe0] sm:$0xff]  }
 0x705   :  { %3852 = vmatprep.subr.bf16.mxu1 %v4049_v57 }
 0x706   :  { %3829 = vmatpush3.bf16.msra.mxu0 %v4037_v55  ;;  %v4079_v55 = vld [vmem:[#allocation7 + $0xc0] sm:$0xff]  }
 0x707   :  { %3830 = vmatprep.subr.bf16.mxu0 %v4042_v58 }
 0x708   :  { %3853 = vmatpush3.bf16.msra.mxu1 %v4049_v57 }
 0x709   :  { %3811 = vmatmul.mubr.msk.bf16.gmra.mxu0 %vm1988_vm4, %v4040_v59  ;;  %3823 = vmatmul.mubr.msk.bf16.gmra.mxu1 %vm1988_vm4, %v4041_v60 }
 0x70a   :  { %3831 = vmatpush3.bf16.msra.mxu0 %v4042_v58  ;;  %3854 = vmatprep.subr.bf16.mxu1 %v4050_v61 }
 0x70b   :  { %3832 = vmatprep.subr.bf16.mxu0 %v4043_v62 }
 0x70c   :  { %3855 = vmatpush3.bf16.msra.mxu1 %v4050_v61 }
 0x70d   :  { %3856 = vmatprep.subr.bf16.mxu1 %v4051_v63 }
 0x70e   :  { %3833 = vmatpush3.bf16.msra.mxu0 %v4043_v62 }
 0x70f   :  { %3834 = vmatprep.subr.bf16.mxu0 %v4044_v0 }
 0x710   :  { %3857 = vmatpush3.bf16.msra.mxu1 %v4051_v63 }
 0x711   :  { %3858 = vmatprep.subr.bf16.mxu1 %v4052_v1 }
 0x712   :  { %3835 = vmatpush3.bf16.msra.mxu0 %v4044_v0 }
 0x713   :  { %3836 = vmatprep.subr.bf16.mxu0 %v4045_v2 }
 0x714   :  { %3859 = vmatpush3.bf16.msra.mxu1 %v4052_v1 }
 0x715   :  { %3860 = vmatprep.subr.bf16.mxu1 %v4053_v3 }
 0x716   :  { %3837 = vmatpush3.bf16.msra.mxu0 %v4045_v2 }
 0x717   :  { %3838 = vmatprep.subr.bf16.mxu0 %v4046_v4 }
 0x718   :  { %3861 = vmatpush3.bf16.msra.mxu1 %v4053_v3 }
 0x719   :  { %3862 = vmatprep.subr.bf16.mxu1 %v4054_v6 }
 0x71a   :  { %3839 = vmatpush3.bf16.msra.mxu0 %v4046_v4 }
 0x71b   :  { %3840 = vmatprep.subr.bf16.mxu0 %v4047_v5 }
 0x71c   :  { %3863 = vmatpush3.bf16.msra.mxu1 %v4054_v6 }
 0x71d   :  { %3864 = vmatprep.subr.bf16.mxu1 %v4055_v7 }
 0x71e   :  { %3841 = vmatpush3.bf16.msra.mxu0 %v4047_v5 }
 0x71f   :  { %3874 = vmatprep.subr.bf16.mxu0 %v4549_v48 }
 0x720   :  { %3865 = vmatpush3.bf16.msra.mxu1 %v4055_v7 }
 0x721   :  { %3886 = vmatprep.subr.bf16.mxu1 %v4064_v8 }
 0x7c1   :  { %v3808_v9 = vpop.f32.mrf.mxu0  ;;  %v3820_v10 = vpop.f32.mrf.mxu1 }
 0x7c3   :  { %v2035_v11 = vpop.f32.mrf.mxu0  ;;  %v2161_v12 = vpop.f32.mrf.mxu1 }
 0x7c5   :  { %v3809_v13 = vpop.f32.mrf.mxu0  ;;  %v3821_v14 = vpop.f32.mrf.mxu1 }
 0x7c6   :  { %v2067_v15 = vpack.c.bf16 %v3809_v13, %v3808_v9  ;;  %v2193_v20 = vpack.c.bf16 %v3821_v14, %v3820_v10 }
 0x7c7   :  { %v2038_v16 = vpop.f32.mrf.mxu0  ;;  %v2164_v17 = vpop.f32.mrf.mxu1 }
 0x7c8   :  { %v2066_v18 = vpack.c.bf16 %v2038_v16, %v2035_v11  ;;  %v2192_v19 = vpack.c.bf16 %v2164_v17, %v2161_v12 }
 0x7c9   :  { %v3812_v21 = vpop.f32.mrf.mxu0  ;;  %v3824_v22 = vpop.f32.mrf.mxu1 }
 0x7ca   :  { %3842 = vmatprep.mubr.bf16.mxu0 %v2192_v19  ;;  %3866 = vmatprep.mubr.bf16.mxu1 %v2066_v18 }
 0x7cb   :  { %v2051_v24 = vpop.f32.mrf.mxu0  ;;  %v2177_v25 = vpop.f32.mrf.mxu1  ;;  %3843 = vmatmul.mubr.bf16.vlgmr.msra.gmra.mxu0 %v2193_v20  ;;  %3867 = vmatmul.mubr.bf16.vlgmr.msra.gmra.mxu1 %v2067_v15 }
 0x7cc   :  { %3875 = vmatpush3.bf16.msra.mxu0 %v4549_v48  ;;  %3887 = vmatpush3.bf16.msra.mxu1 %v4064_v8 }
 0x7cd   :  { %3876 = vmatprep.subr.bf16.mxu0 %v4553_v49  ;;  %v3813_v26 = vpop.f32.mrf.mxu0  ;;  %v3825_v27 = vpop.f32.mrf.mxu1  ;;  %3888 = vmatprep.subr.bf16.mxu1 %v4065_v23 }
 0x7ce   :  { %v2069_v28 = vpack.c.bf16 %v3813_v26, %v3812_v21  ;;  %v2195_v34 = vpack.c.bf16 %v3825_v27, %v3824_v22 }
 0x7cf   :  { %v2054_v29 = vpop.f32.mrf.mxu0  ;;  %v2180_v30 = vpop.f32.mrf.mxu1 }
 0x7d0   :  { %v2068_v31 = vpack.c.bf16 %v2054_v29, %v2051_v24  ;;  %v2194_v32 = vpack.c.bf16 %v2180_v30, %v2177_v25  ;;  %3877 = vmatpush3.bf16.msra.mxu0 %v4553_v49  ;;  %3889 = vmatpush3.bf16.msra.mxu1 %v4065_v23 }
 0x7d1   :  { %3910 = vmatprep.subr.bf16.mxu0 %v4549_v48  ;;  %3890 = vmatprep.subr.bf16.mxu1 %v4066_v42 }
 0x7d2   :  { %3846 = vmatprep.mubr.bf16.mxu0 %v2194_v32  ;;  %3870 = vmatprep.mubr.bf16.mxu1 %v2068_v31 }
 0x7d3   :  { %3847 = vmatmul.mubr.bf16.gmra.mxu0 %v2195_v34  ;;  %3871 = vmatmul.mubr.bf16.gmra.mxu1 %v2069_v28 }
 0x7d4   :  { %3878 = vmatprep.mubr.msk.bf16.mxu0 %vm1988_vm4, %v4056_v33  ;;  %3891 = vmatpush3.bf16.msra.mxu1 %v4066_v42 }
 0x7d5   :  { %3892 = vmatprep.subr.bf16.mxu1 %v4067_v43 }
 0x7d8   :  { %3893 = vmatpush3.bf16.msra.mxu1 %v4067_v43 }
 0x7d9   :  { %3894 = vmatprep.subr.bf16.mxu1 %v4068_v44 }
 0x7db   :  { %3879 = vmatmul.mubr.msk.bf16.vlgmr.msra.gmra.mxu0 %vm1988_vm4, %v4057_v35 }
 0x7dc   :  { %3911 = vmatpush3.bf16.msra.mxu0 %v4549_v48  ;;  %3882 = vmatprep.mubr.msk.bf16.mxu0 %vm1988_vm4, %v4058_v36  ;;  %v4072_v48 = vld [vmem:[#allocation7 + $0x88] sm:$0xff]  }
 0x7dd   :  { %3912 = vmatprep.subr.bf16.mxu0 %v4553_v49  ;;  %3895 = vmatpush3.bf16.msra.mxu1 %v4068_v44 }
 0x7de   :  { %3896 = vmatprep.subr.bf16.mxu1 %v4070_v46 }
 0x7e0   :  { %3913 = vmatpush3.bf16.msra.mxu0 %v4553_v49  ;;  %v4073_v49 = vld [vmem:[#allocation7 + $0xe8] sm:$0xff]  }
 0x7e1   :  { %3922 = vmatprep.subr.bf16.mxu0 %v4069_v45  ;;  %3897 = vmatpush3.bf16.msra.mxu1 %v4070_v46 }
 0x7e2   :  { %3898 = vmatprep.subr.bf16.mxu1 %v4072_v48 }
 0x7e3   :  { %3883 = vmatmul.mubr.msk.bf16.gmra.mxu0 %vm1988_vm4, %v4059_v37 }
 0x7e4   :  { %3914 = vmatprep.mubr.msk.bf16.mxu0 %vm1988_vm4, %v4060_v38 }
 0x7e5   :  { %3899 = vmatpush3.bf16.msra.mxu1 %v4072_v48 }
 0x7e6   :  { %3900 = vmatprep.subr.bf16.mxu1 %v4074_v50 }
 0x7e9   :  { %3901 = vmatpush3.bf16.msra.mxu1 %v4074_v50 }
 0x7eb   :  { %3915 = vmatmul.mubr.msk.bf16.vlgmr.msra.gmra.mxu0 %vm1988_vm4, %v4061_v39 }
 0x7ec   :  { %3918 = vmatprep.mubr.msk.bf16.mxu0 %vm1988_vm4, %v4062_v40  ;;  %3923 = vmatpush3.bf16.msra.mxu0 %v4069_v45 }
 0x7ed   :  { %3924 = vmatprep.subr.bf16.mxu0 %v4071_v47 }
 0x7f0   :  { %3925 = vmatpush3.bf16.msra.mxu0 %v4071_v47 }
 0x7f1   :  { %3926 = vmatprep.subr.bf16.mxu0 %v4073_v49 }
 0x7f3   :  { %3919 = vmatmul.mubr.msk.bf16.gmra.mxu0 %vm1988_vm4, %v4063_v41 }
 0x7f4   :  { %3927 = vmatpush3.bf16.msra.mxu0 %v4073_v49 }
 0x7f5   :  { %3928 = vmatprep.subr.bf16.mxu0 %v4075_v51 }
 0x7f8   :  { %3929 = vmatpush3.bf16.msra.mxu0 %v4075_v51 }
 0x7f9   :  { %3930 = vmatprep.subr.bf16.mxu0 %v4076_v52 }
 0x7fc   :  { %3931 = vmatpush3.bf16.msra.mxu0 %v4076_v52 }
 0x7fd   :  { %3932 = vmatprep.subr.bf16.mxu0 %v4077_v53 }
 0x800   :  { %3933 = vmatpush3.bf16.msra.mxu0 %v4077_v53 }
 0x801   :  { %3934 = vmatprep.subr.bf16.mxu0 %v4078_v54 }
 0x804   :  { %3935 = vmatpush3.bf16.msra.mxu0 %v4078_v54 }
 0x805   :  { %3936 = vmatprep.subr.bf16.mxu0 %v4079_v55 }
 0x808   :  { %3937 = vmatpush3.bf16.msra.mxu0 %v4079_v55 }
 0x88b   :  { %v3844_v56 = vpop.f32.mrf.mxu0  ;;  %v3868_v24 = vpop.f32.mrf.mxu1 }
 0x88c   :  { %v2417_v36 = vadd.f32 %v3868_v24, %v3844_v56 }
 0x88d   :  { %v2295_v57 = vpop.f32.mrf.mxu0  ;;  %v2408_v25 = vpop.f32.mrf.mxu1 }
 0x88e   :  { %v2409_v38 = vadd.f32 %v2408_v25, %v2295_v57 }
 0x88f   :  { %v3845_v58 = vpop.f32.mrf.mxu0  ;;  %v3869_v26 = vpop.f32.mrf.mxu1 }
 0x890   :  { %v2420_v41 = vadd.f32 %v3869_v26, %v3845_v58 }
 0x891   :  { %v2298_v59 = vpop.f32.mrf.mxu0  ;;  %v2411_v27 = vpop.f32.mrf.mxu1 }
 0x892   :  { %v2412_v46 = vadd.f32 %v2411_v27, %v2298_v59 }
 0x893   :  { %v4625_v60 = vpop.f32.mrf.mxu0  ;;  %v3872_v28 = vpop.f32.mrf.mxu1 }
 0x894   :  { %v2433_v50 = vadd.f32 %v3872_v28, %v4625_v60 }
 0x895   :  { %v4627_v61 = vpop.f32.mrf.mxu0  ;;  %v2424_v29 = vpop.f32.mrf.mxu1 }
 0x896   :  { %v2425_v55 = vadd.f32 %v2424_v29, %v4627_v61 }
 0x897   :  { %v4629_v62 = vpop.f32.mrf.mxu0  ;;  %v3873_v30 = vpop.f32.mrf.mxu1 }
 0x899   :  { %v4631_v63 = vpop.f32.mrf.mxu0  ;;  %v2427_v31 = vpop.f32.mrf.mxu1 }
 0x89a   :  { %v2428_v60 = vadd.f32 %v2427_v31, %v4631_v63 }
 0x89b   :  { %v3880_v0 = vpop.f32.mrf.mxu0 }
 0x89d   :  { %v2514_v1 = vpop.f32.mrf.mxu0 }
 0x89f   :  { %v3881_v2 = vpop.f32.mrf.mxu0 }
 0x8a0   :  { %v2546_v5 = vpack.c.bf16 %v3881_v2, %v3880_v0  ;;  %v2436_v0 = vadd.f32 %v3873_v30, %v4629_v62 }
 0x8a1   :  { %v2517_v3 = vpop.f32.mrf.mxu0 }
 0x8a2   :  { %v2545_v4 = vpack.c.bf16 %v2517_v3, %v2514_v1 }
 0x8a3   :  { %v3884_v6 = vpop.f32.mrf.mxu0 }
 0x8a4   :  { %3902 = vmatprep.mubr.bf16.mxu1 %v2545_v4 }
 0x8a5   :  { %v2530_v7 = vpop.f32.mrf.mxu0  ;;  %3903 = vmatmul.mubr.bf16.vlgmr.msra.gmra.mxu1 %v2546_v5 }
 0x8a7   :  { %v3885_v8 = vpop.f32.mrf.mxu0 }
 0x8a8   :  { %v2548_v11 = vpack.c.bf16 %v3885_v8, %v3884_v6 }
 0x8a9   :  { %v2533_v9 = vpop.f32.mrf.mxu0 }
 0x8aa   :  { %v2547_v10 = vpack.c.bf16 %v2533_v9, %v2530_v7 }
 0x8ab   :  { %v3916_v12 = vpop.f32.mrf.mxu0 }
 0x8ac   :  { %3906 = vmatprep.mubr.bf16.mxu1 %v2547_v10 }
 0x8ad   :  { %3907 = vmatmul.mubr.bf16.gmra.mxu1 %v2548_v11  ;;  %v2762_v13 = vpop.f32.mrf.mxu0 }
 0x8af   :  { %v3917_v14 = vpop.f32.mrf.mxu0 }
 0x8b0   :  { %v2794_v17 = vpack.c.bf16 %v3917_v14, %v3916_v12 }
 0x8b1   :  { %v2765_v15 = vpop.f32.mrf.mxu0 }
 0x8b2   :  { %v2793_v16 = vpack.c.bf16 %v2765_v15, %v2762_v13 }
 0x8b3   :  { %v3920_v18 = vpop.f32.mrf.mxu0 }
 0x8b4   :  { %3938 = vmatprep.mubr.bf16.mxu0 %v2793_v16 }
 0x8b5   :  { %v2778_v19 = vpop.f32.mrf.mxu0  ;;  %3939 = vmatmul.mubr.bf16.vlgmr.msra.gmra.mxu0 %v2794_v17 }
 0x8b7   :  { %v3921_v20 = vpop.f32.mrf.mxu0 }
 0x8b8   :  { %v2796_v23 = vpack.c.bf16 %v3921_v20, %v3920_v18 }
 0x8b9   :  { %v2781_v21 = vpop.f32.mrf.mxu0 }
 0x8ba   :  { %v2795_v22 = vpack.c.bf16 %v2781_v21, %v2778_v19 }
 0x8bc   :  { %3942 = vmatprep.mubr.bf16.mxu0 %v2795_v22 }
 0x8bd   :  { %3943 = vmatmul.mubr.bf16.gmra.mxu0 %v2796_v23 }
 0x965   :  { %v3904_v32 = vpop.f32.mrf.mxu1 }
 0x966   :  { %v2681_v39 = vadd.f32 %v3904_v32, %v2417_v36 }
 0x967   :  { %v2648_v33 = vpop.f32.mrf.mxu1 }
 0x968   :  { %v2679_v42 = vadd.f32 %v2648_v33, %v2409_v38 }
 0x969   :  { %v3905_v34 = vpop.f32.mrf.mxu1 }
 0x96a   :  { %v2682_v47 = vadd.f32 %v3905_v34, %v2420_v41 }
 0x96b   :  { %v2651_v35 = vpop.f32.mrf.mxu1 }
 0x96c   :  { %v2680_v51 = vadd.f32 %v2651_v35, %v2412_v46 }
 0x96d   :  { %v3908_v37 = vpop.f32.mrf.mxu1 }
 0x96e   :  { %v2685_v56 = vadd.f32 %v3908_v37, %v2433_v50 }
 0x96f   :  { %v2664_v44 = vpop.f32.mrf.mxu1 }
 0x970   :  { %v2683_v59 = vadd.f32 %v2664_v44, %v2425_v55 }
 0x971   :  { %v3909_v53 = vpop.f32.mrf.mxu1 }
 0x972   :  { %v2686_v4 = vadd.f32 %v3909_v53, %v2436_v0 }
 0x973   :  { %v2667_v2 = vpop.f32.mrf.mxu1 }
 0x974   :  { %v2684_v7 = vadd.f32 %v2667_v2, %v2428_v60 }
 0x975   :  { %v3940_v40 = vpop.f32.mrf.mxu0 }
 0x976   :  { %v2929_v43 = vadd.f32 %v3940_v40, %v2681_v39 }
 0x977   :  { %v2896_v45 = vpop.f32.mrf.mxu0 }
 0x978   :  { %4084 = vtanh.f32 %v2929_v43  ;;  %v2927_v48 = vadd.f32 %v2896_v45, %v2679_v42 }
 0x979   :  { %v3941_v49 = vpop.f32.mrf.mxu0 }
 0x97a   :  { %4086 = vtanh.f32 %v2927_v48  ;;  %v2930_v52 = vadd.f32 %v3941_v49, %v2682_v47 }
 0x97b   :  { %v2899_v54 = vpop.f32.mrf.mxu0 }
 0x97c   :  { %4088 = vtanh.f32 %v2930_v52  ;;  %v2928_v57 = vadd.f32 %v2899_v54, %v2680_v51 }
 0x97d   :  { %v3944_v58 = vpop.f32.mrf.mxu0 }
 0x97e   :  { %4090 = vtanh.f32 %v2928_v57  ;;  %v2933_v1 = vadd.f32 %v3944_v58, %v2685_v56 }
 0x97f   :  { %v2912_v3 = vpop.f32.mrf.mxu0 }
 0x980   :  { %4092 = vtanh.f32 %v2933_v1  ;;  %v2931_v5 = vadd.f32 %v2912_v3, %v2683_v59 }
 0x981   :  { %v3945_v6 = vpop.f32.mrf.mxu0 }
 0x982   :  { %4094 = vtanh.f32 %v2931_v5  ;;  %v2934_v61 = vadd.f32 %v3945_v6, %v2686_v4 }
 0x983   :  { %v2915_v8 = vpop.f32.mrf.mxu0 }
 0x984   :  { %4096 = vtanh.f32 %v2934_v61  ;;  %v2932_v9 = vadd.f32 %v2915_v8, %v2684_v7 }
 0x985   :  { %v4085_v10 = vpop.eup %4084 }
 0x986   :  { %2945 = vst [vmem:[%s4674_s13 + $0x10] sm:$0xff] %v4085_v10  ;;  %4098 = vtanh.f32 %v2932_v9 }
 0x987   :  { %v4087_v62 = vpop.eup %4086 }
 0x988   :  { %2943 = vst [vmem:[%s4674_s13] sm:$0xff] %v4087_v62 }
 0x989   :  { %v4089_v63 = vpop.eup %4088 }
 0x98a   :  { %2946 = vst [vmem:[%s4674_s13 + $0x18] sm:$0xff] %v4089_v63 }
 0x98b   :  { %v4091_v11 = vpop.eup %4090 }
 0x98c   :  { %2944 = vst [vmem:[%s4674_s13 + $0x8] sm:$0xff] %v4091_v11 }
 0x98d   :  { %v4093_v12 = vpop.eup %4092 }
 0x98e   :  { %2949 = vst [vmem:[%s4674_s13 + $0x30] sm:$0xff] %v4093_v12 }
 0x98f   :  { %v4095_v13 = vpop.eup %4094 }
 0x990   :  { %2947 = vst [vmem:[%s4674_s13 + $0x20] sm:$0xff] %v4095_v13 }
 0x991   :  { %v4097_v14 = vpop.eup %4096 }
 0x992   :  { %2950 = vst [vmem:[%s4674_s13 + $0x38] sm:$0xff] %v4097_v14 }
 0x993   :  { %v4099_v15 = vpop.eup %4098 }
 0x994   :  { %2948 = vst [vmem:[%s4674_s13 + $0x28] sm:$0xff] %v4099_v15 }
 0x995   :  { %2955 = vsyncpa [#allocation3], 1 }
 0x996   :  { %2956 = vsyncpa [#allocation5], 1 }
 0x997   :  { %2957 = vsyncpa [#allocation8], 1 }

</bundles_post_ra>
